<compile_context>
chip_gen: v7x
topology: tpu7x:2x2x1
jax: 0.10.0
libtpu: 0.0.40
codegen_flags: <defaults>
</compile_context>

<pallas_src>
import functools
import math

import jax
import jax.numpy as jnp
from jax.experimental import pallas as pl
from jax.experimental.pallas import tpu as pltpu


# ----------------------- in-kernel math helpers -----------------------

def _erf(x):
    # Abramowitz & Stegun 7.1.26; divide moved to the EUP via approx reciprocal.
    a1, a2, a3, a4, a5 = (0.254829592, -0.284496736, 1.421413741,
                          -1.453152027, 1.061405429)
    p = 0.3275911
    s = jnp.where(x < 0.0, -1.0, 1.0)
    z = jnp.abs(x)
    t = pl.reciprocal(1.0 + p * z, approx=True)
    poly = ((((a5 * t + a4) * t + a3) * t + a2) * t + a1) * t
    return s * (1.0 - poly * jnp.exp(-z * z))


def _gelu_exact(x):
    return 0.5 * x * (1.0 + _erf(x * 0.7071067811865476))


def _ln(x, g, b, eps=1e-5):
    mu = jnp.mean(x, axis=-1, keepdims=True)
    xc = x - mu
    var = jnp.mean(xc * xc, axis=-1, keepdims=True)
    return xc * jax.lax.rsqrt(var + eps) * g + b


def _conv_taps(h, w_taps, *, n_out, stride, pad):
    """1D conv as sum over kernel taps.

    h:      (n_in, Cin) f32 activations (VMEM-resident values).
    w_taps: (K, Cin, Cout) bf16, w_taps[k] == torch_weight[:, :, k].T
    Row gather h[l*stride + k - pad] is done with a 0/1 selection matmul built
    from iotas (exact: operands are already bf16, so the gather adds no error).
    """
    n_in = h.shape[0]
    k_taps = w_taps.shape[0]
    hb = h.astype(jnp.bfloat16)
    out_rows = jax.lax.broadcasted_iota(jnp.int32, (n_out, n_in), 0)
    in_rows = jax.lax.broadcasted_iota(jnp.int32, (n_out, n_in), 1)
    acc = None
    for k in range(k_taps):
        sel = jnp.where(in_rows == out_rows * stride + (k - pad),
                        1.0, 0.0).astype(jnp.bfloat16)             # (n_out, n_in)
        tap = jnp.dot(sel, hb, preferred_element_type=jnp.float32)  # (n_out, Cin)
        y = jnp.dot(tap.astype(jnp.bfloat16), w_taps[k],
                    preferred_element_type=jnp.float32)             # (n_out, Cout)
        acc = y if acc is None else acc + y
    return acc


# ----------------------------- Pallas kernels -----------------------------

def _stem_kernel(xc1_ref, w1_ref, w2_ref, w3_ref, bn1_ref, bn2_ref, bn3_ref,
                 o_ref, *, l2, l3):
    # One batch element per grid step; everything stays in VMEM.
    bn1 = bn1_ref[...]
    bn2 = bn2_ref[...]
    bn3 = bn3_ref[...]
    # conv1 (im2col rows supplied) -> GELU -> BN affine
    h = jnp.dot(xc1_ref[0].astype(jnp.bfloat16), w1_ref[...],
                preferred_element_type=jnp.float32)
    h = _gelu_exact(h) * bn1[0:1, :] + bn1[1:2, :]
    # conv2: K=3, stride 1, pad 1
    h = _conv_taps(h, w2_ref[...], n_out=l2, stride=1, pad=1)
    h = _gelu_exact(h) * bn2[0:1, :] + bn2[1:2, :]
    # conv3: K=3, stride 2, pad 1
    h = _conv_taps(h, w3_ref[...], n_out=l3, stride=2, pad=1)
    h = _gelu_exact(h) * bn3[0:1, :] + bn3[1:2, :]
    o_ref[0] = h


def _block_kernel(x_ref, ln1_ref, wqkv_ref, wo_ref, ln2_ref,
                  w1_ref, b1_ref, w2_ref, b2_ref, o_ref, *, num_heads, scale):
    f32, bf16 = jnp.float32, jnp.bfloat16
    x = x_ref[0]                                   # (S, E) f32, one batch element
    seq, emb = x.shape
    dh = emb // num_heads
    ln1 = ln1_ref[...]
    ln2 = ln2_ref[...]
    wo = wo_ref[...]                               # (E, E) bf16

    # ---- multi-head self attention (pre-norm) ----
    xn = _ln(x, ln1[0:1, :], ln1[1:2, :])
    qkv = jnp.dot(xn.astype(bf16), wqkv_ref[...],
                  preferred_element_type=f32)      # (S, 3E)
    attn = None
    for hi in range(num_heads):
        q = qkv[:, hi * dh:(hi + 1) * dh].astype(bf16)
        k = qkv[:, emb + hi * dh:emb + (hi + 1) * dh].astype(bf16)
        v = qkv[:, 2 * emb + hi * dh:2 * emb + (hi + 1) * dh].astype(bf16)
        s = jax.lax.dot_general(q, k, (((1,), (1,)), ((), ())),
                                preferred_element_type=f32) * scale
        m = jnp.max(s, axis=-1, keepdims=True)
        p = jnp.exp(s - m)
        p = p * pl.reciprocal(jnp.sum(p, axis=-1, keepdims=True), approx=True)
        o_h = jnp.dot(p.astype(bf16), v, preferred_element_type=f32)   # (S, dh)
        # fold the head-concat into the out-projection: o_h @ Wo[h*dh:(h+1)*dh]
        contrib = jnp.dot(o_h.astype(bf16), wo[hi * dh:(hi + 1) * dh, :],
                          preferred_element_type=f32)
        attn = contrib if attn is None else attn + contrib
    x = x + attn                                   # residual 1 (f32 stream)

    # ---- MLP (pre-norm) ----
    xn2 = _ln(x, ln2[0:1, :], ln2[1:2, :])
    hdn = jnp.dot(xn2.astype(bf16), w1_ref[...],
                  preferred_element_type=f32) + b1_ref[...]
    hdn = _gelu_exact(hdn)
    mlp = jnp.dot(hdn.astype(bf16), w2_ref[...],
                  preferred_element_type=f32) + b2_ref[...]
    o_ref[0] = x + mlp                             # residual 2


def _head_kernel(*refs, acts):
    # refs = (x, w0, b0, w1, b1, ..., out); chained matmuls in VMEM.
    f32, bf16 = jnp.float32, jnp.bfloat16
    h = refs[0][...]
    for i, act in enumerate(acts):
        w = refs[1 + 2 * i][...]                   # bf16
        b = refs[2 + 2 * i][...]                   # (1, N) f32
        h = jnp.dot(h.astype(bf16), w, preferred_element_type=f32) + b
        if act == "relu":
            h = jnp.maximum(h, 0.0)
        elif act == "gelu":
            h = _gelu_exact(h)
    refs[-1][...] = h


# ------------------------------ forward pass ------------------------------

def conv_transformer_forward(params, x_bcl, *, num_heads):
    """x_bcl: (B, 1, L) -- PyTorch NCL at the boundary."""
    f32, bf16 = jnp.float32, jnp.bfloat16
    B, _, L = x_bcl.shape

    # ---------------- conv stem (one fused kernel) ----------------
    k1, s1, p1 = 10, 2, 4
    l1 = (L + 2 * p1 - k1) // s1 + 1
    l2 = (l1 + 2 * 1 - 3) // 1 + 1
    l3 = (l2 + 2 * 1 - 3) // 2 + 1

    # conv1 im2col comes directly from the network input (tiny, exact gather).
    x2d = x_bcl[:, 0, :].astype(f32)
    xp = jnp.pad(x2d, ((0, 0), (p1, p1)))
    gather = jnp.arange(l1)[:, None] * s1 + jnp.arange(k1)[None, :]
    xcol1 = xp[:, gather]                                   # (B, l1, k1)

    w1 = jnp.transpose(params["conv1_w"], (2, 1, 0)).reshape(k1, -1).astype(bf16)
    w2t = jnp.transpose(params["conv2_w"], (2, 1, 0)).astype(bf16)  # (3, Ch, C)
    w3t = jnp.transpose(params["conv3_w"], (2, 1, 0)).astype(bf16)  # (3, C, C)

    def bn_affine(bn):
        g, b, m, v, eps = bn
        s = g / jnp.sqrt(v + eps)
        return jnp.stack([s, b - m * s], axis=0).astype(f32)        # (2, C)

    bn1, bn2, bn3 = (bn_affine(params["bn1"]), bn_affine(params["bn2"]),
                     bn_affine(params["bn3"]))
    ch = w1.shape[1]
    c = w3t.shape[2]

    stem_out = pl.pallas_call(
        functools.partial(_stem_kernel, l2=l2, l3=l3),
        out_shape=jax.ShapeDtypeStruct((B, l3, c), f32),
        grid=(B,),
        in_specs=[
            pl.BlockSpec((1, l1, k1), lambda b: (b, 0, 0)),
            pl.BlockSpec((k1, ch), lambda b: (0, 0)),
            pl.BlockSpec((3, ch, c), lambda b: (0, 0, 0)),
            pl.BlockSpec((3, c, c), lambda b: (0, 0, 0)),
            pl.BlockSpec((2, ch), lambda b: (0, 0)),
            pl.BlockSpec((2, c), lambda b: (0, 0)),
            pl.BlockSpec((2, c), lambda b: (0, 0)),
        ],
        out_specs=pl.BlockSpec((1, l3, c), lambda b: (b, 0, 0)),
        compiler_params=pltpu.CompilerParams(dimension_semantics=("parallel",)),
    )(xcol1, w1, w2t, w3t, bn1, bn2, bn3)

    # ---------------- transformer blocks (one fused kernel each) ----------------
    # torch permutes to (S, B, E); attention/LN/MLP are equivalent in (B, S, E),
    # so we keep batch-major layout (contiguous per-batch slabs in-kernel) and
    # take the last sequence position at the end.
    h = stem_out                                            # (B, S, E)
    S, E = l3, c
    scale = 1.0 / math.sqrt(E // num_heads)

    for bp in params["blocks"]:
        wqkv = jnp.concatenate([bp["wq"], bp["wk"], bp["wv"]], axis=1).astype(bf16)
        wo = bp["wo"].astype(bf16)
        ln1 = jnp.stack([bp["ln1_g"], bp["ln1_b"]], axis=0).astype(f32)
        ln2 = jnp.stack([bp["ln2_g"], bp["ln2_b"]], axis=0).astype(f32)
        w1b = bp["w1"].astype(bf16)
        w2b = bp["w2"].astype(bf16)
        b1 = bp["b1"].reshape(1, -1).astype(f32)
        b2 = bp["b2"].reshape(1, -1).astype(f32)
        hid = w1b.shape[1]

        h = pl.pallas_call(
            functools.partial(_block_kernel, num_heads=num_heads, scale=scale),
            out_shape=jax.ShapeDtypeStruct((B, S, E), f32),
            grid=(B,),
            in_specs=[
                pl.BlockSpec((1, S, E), lambda b: (b, 0, 0)),
                pl.BlockSpec((2, E), lambda b: (0, 0)),
                pl.BlockSpec((E, 3 * E), lambda b: (0, 0)),
                pl.BlockSpec((E, E), lambda b: (0, 0)),
                pl.BlockSpec((2, E), lambda b: (0, 0)),
                pl.BlockSpec((E, hid), lambda b: (0, 0)),
                pl.BlockSpec((1, hid), lambda b: (0, 0)),
                pl.BlockSpec((hid, E), lambda b: (0, 0)),
                pl.BlockSpec((1, E), lambda b: (0, 0)),
            ],
            out_specs=pl.BlockSpec((1, S, E), lambda b: (b, 0, 0)),
            compiler_params=pltpu.CompilerParams(
                dimension_semantics=("parallel",)),
        )(h, ln1, wqkv, wo, ln2, w1b, b1, w2b, b2)

    # ---------------- classifier head (one fused kernel) ----------------
    z = h[:, -1, :]                                         # last seq position, (B, E)
    # TODO(synk): nn.Dropout layers are identity here (inference semantics).
    layers = [(params["fc_t_w"], params["fc_t_b"], "none")]
    for (w, b) in params["fcs"]:
        layers.append((w, b, "relu"))                       # activation = ReLU
    layers.append((params["out_w"], params["out_b"], "none"))

    acts = tuple(a for (_, _, a) in layers)
    flat = []
    for (w, b, _) in layers:
        flat.append(w.astype(bf16))
        flat.append(b.reshape(1, -1).astype(f32))
    n_cls = layers[-1][0].shape[1]

    vmem = pl.BlockSpec(memory_space=pltpu.MemorySpace.VMEM)
    out = pl.pallas_call(
        functools.partial(_head_kernel, acts=acts),
        out_shape=jax.ShapeDtypeStruct((B, n_cls), f32),
        in_specs=[vmem] * (1 + len(flat)),
        out_specs=vmem,
    )(z, *flat)
    return out


# ------------------------------ param init ------------------------------

def init_params(key, *, dim, depth, fc_neurons, fc_transformer, num_classes):
    keys = iter(jax.random.split(key, 128))

    def nrm(shape, std):
        return jax.random.normal(next(keys), shape, jnp.float32) * std

    c_half = dim // 2
    p = {
        # Conv1d weights, kaiming-normal, PyTorch layout (Cout, Cin, K)
        "conv1_w": nrm((c_half, 1, 10), math.sqrt(2.0 / (1 * 10))),
        "conv2_w": nrm((dim, c_half, 3), math.sqrt(2.0 / (c_half * 3))),
        "conv3_w": nrm((dim, dim, 3), math.sqrt(2.0 / (dim * 3))),
    }
    for i, ci in zip((1, 2, 3), (c_half, dim, dim)):
        # (gamma, beta, running_mean, running_var, eps) -- per init_weight()
        p[f"bn{i}"] = (jnp.ones((ci,)), jnp.zeros((ci,)),
                       jnp.zeros((ci,)), jnp.ones((ci,)), 1e-5)

    hid = int(dim * 4.0)
    blocks = []
    for _ in range(depth):
        blocks.append(dict(
            ln1_g=jnp.ones((dim,)), ln1_b=jnp.zeros((dim,)),
            # Linear weights stored as (in, out) == torch W^T (synthetic init)
            wq=nrm((dim, dim), 1.0 / math.sqrt(dim)),
            wk=nrm((dim, dim), 1.0 / math.sqrt(dim)),
            wv=nrm((dim, dim), 1.0 / math.sqrt(dim)),
            wo=nrm((dim, dim), 1.0 / math.sqrt(dim)),
            ln2_g=jnp.ones((dim,)), ln2_b=jnp.zeros((dim,)),
            w1=nrm((dim, hid), 1.0 / math.sqrt(dim)), b1=nrm((hid,), 0.02),
            w2=nrm((hid, dim), 1.0 / math.sqrt(hid)), b2=nrm((dim,), 0.02),
        ))
    p["blocks"] = blocks

    p["fc_t_w"] = nrm((dim, fc_transformer), 1.0 / math.sqrt(dim))
    p["fc_t_b"] = nrm((fc_transformer,), 0.02)
    fcs, prev = [], fc_transformer
    for n in fc_neurons:
        fcs.append((nrm((prev, n), 1.0 / math.sqrt(prev)), nrm((n,), 0.02)))
        prev = n
    p["fcs"] = fcs
    p["out_w"] = nrm((prev, num_classes), 1.0 / math.sqrt(prev))
    p["out_b"] = nrm((num_classes,), 0.02)
    return p


# --------------------------------- main ---------------------------------

if __name__ == "__main__":
    B, L = 2, 64                      # input_size = 64 -> seq len 16 after stem
    DIM, HEADS, DEPTH = 32, 4, 2      # transformer_dim, num_heads, depth
    FC_NEURONS, FC_T, N_CLS = [64, 32], 32, 5

    key = jax.random.PRNGKey(0)
    pkey, xkey = jax.random.split(key)
    params = init_params(pkey, dim=DIM, depth=DEPTH, fc_neurons=FC_NEURONS,
                         fc_transformer=FC_T, num_classes=N_CLS)
    x = jax.random.normal(xkey, (B, 1, L), jnp.float32)

    fwd = jax.jit(functools.partial(conv_transformer_forward, num_heads=HEADS))
    out = fwd(params, x)
    jax.block_until_ready(out)
    assert out.shape == (B, N_CLS), out.shape
    print("KERNEL_OK")
</pallas_src>

<mosaic_0001>
module attributes {stable_mosaic.version = 11 : i64} {
  func.func @_stem_kernel(%arg0: i32, %arg1: memref<1x32x10xf32, #tpu.memory_space<vmem>>, %arg2: memref<10x16xbf16, #tpu.memory_space<vmem>>, %arg3: memref<3x16x32xbf16, #tpu.memory_space<vmem>>, %arg4: memref<3x32x32xbf16, #tpu.memory_space<vmem>>, %arg5: memref<2x16xf32, #tpu.memory_space<vmem>>, %arg6: memref<2x32xf32, #tpu.memory_space<vmem>>, %arg7: memref<2x32xf32, #tpu.memory_space<vmem>>, %arg8: memref<1x16x32xf32, #tpu.memory_space<vmem>>) attributes {dimension_semantics = [#tpu.dimension_semantics<parallel>], iteration_bounds = array<i64: 2>, scalar_prefetch = 0 : i64, scratch_operands = 0 : i64, tpu.core_type = #tpu.core_type<tc>, window_params = [{transform_indices = @transform_0, window_bounds = array<i64: 1, 32, 10>}, {pipeline_mode = #tpu.pipeline_mode<synchronous>, transform_indices = @transform_1, window_bounds = array<i64: 10, 16>}, {pipeline_mode = #tpu.pipeline_mode<synchronous>, transform_indices = @transform_2, window_bounds = array<i64: 3, 16, 32>}, {pipeline_mode = #tpu.pipeline_mode<synchronous>, transform_indices = @transform_3, window_bounds = array<i64: 3, 32, 32>}, {pipeline_mode = #tpu.pipeline_mode<synchronous>, transform_indices = @transform_4, window_bounds = array<i64: 2, 16>}, {pipeline_mode = #tpu.pipeline_mode<synchronous>, transform_indices = @transform_5, window_bounds = array<i64: 2, 32>}, {pipeline_mode = #tpu.pipeline_mode<synchronous>, transform_indices = @transform_6, window_bounds = array<i64: 2, 32>}, {transform_indices = @transform_7, window_bounds = array<i64: 1, 16, 32>}]} {
    %c0 = arith.constant 0 : index
    %c0_0 = arith.constant 0 : index
    %0 = vector.load %arg5[%c0, %c0_0] : memref<2x16xf32, #tpu.memory_space<vmem>>, vector<2x16xf32>
    %c0_1 = arith.constant 0 : index
    %c0_2 = arith.constant 0 : index
    %1 = vector.load %arg6[%c0_1, %c0_2] : memref<2x32xf32, #tpu.memory_space<vmem>>, vector<2x32xf32>
    %c0_3 = arith.constant 0 : index
    %c0_4 = arith.constant 0 : index
    %2 = vector.load %arg7[%c0_3, %c0_4] : memref<2x32xf32, #tpu.memory_space<vmem>>, vector<2x32xf32>
    %c0_5 = arith.constant 0 : index
    %c0_6 = arith.constant 0 : index
    %c0_7 = arith.constant 0 : index
    %3 = vector.load %arg1[%c0_5, %c0_6, %c0_7] : memref<1x32x10xf32, #tpu.memory_space<vmem>>, vector<1x32x10xf32>
    %4 = vector.shape_cast %3 : vector<1x32x10xf32> to vector<32x10xf32>
    %5 = arith.truncf %4 : vector<32x10xf32> to vector<32x10xbf16>
    %c0_8 = arith.constant 0 : index
    %c0_9 = arith.constant 0 : index
    %6 = vector.load %arg2[%c0_8, %c0_9] : memref<10x16xbf16, #tpu.memory_space<vmem>>, vector<10x16xbf16>
    %cst = arith.constant dense<0.000000e+00> : vector<32x16xf32>
    %7 = tpu.matmul %5, %6, %cst {dimension_numbers = #tpu.dot_dimension_numbers<[1], [0], [0], [1], [0, 0, 1, 1], [], []>} : vector<32x10xbf16>, vector<10x16xbf16>, vector<32x16xf32> -> vector<32x16xf32>
    %cst_10 = arith.constant 5.000000e-01 : f32
    %8 = vector.broadcast %cst_10 : f32 to vector<32x16xf32>
    %9 = arith.mulf %8, %7 : vector<32x16xf32>
    %cst_11 = arith.constant 0.707106769 : f32
    %10 = vector.broadcast %cst_11 : f32 to vector<32x16xf32>
    %11 = arith.mulf %7, %10 : vector<32x16xf32>
    %cst_12 = arith.constant 0.000000e+00 : f32
    %12 = vector.broadcast %cst_12 : f32 to vector<32x16xf32>
    %13 = arith.cmpf olt, %11, %12 : vector<32x16xf32>
    %cst_13 = arith.constant -1.000000e+00 : f32
    %cst_14 = arith.constant 1.000000e+00 : f32
    %14 = vector.broadcast %cst_13 : f32 to vector<32x16xf32>
    %15 = vector.broadcast %cst_14 : f32 to vector<32x16xf32>
    %16 = arith.select %13, %14, %15 : vector<32x16xi1>, vector<32x16xf32>
    %17 = math.absf %11 : vector<32x16xf32>
    %cst_15 = arith.constant 0.327591091 : f32
    %18 = vector.broadcast %cst_15 : f32 to vector<32x16xf32>
    %19 = arith.mulf %18, %17 : vector<32x16xf32>
    %cst_16 = arith.constant 1.000000e+00 : f32
    %20 = vector.broadcast %cst_16 : f32 to vector<32x16xf32>
    %21 = arith.addf %20, %19 : vector<32x16xf32>
    %22 = tpu.reciprocal %21 {approx = true} : vector<32x16xf32> -> vector<32x16xf32>
    %cst_17 = arith.constant 1.06140542 : f32
    %23 = vector.broadcast %cst_17 : f32 to vector<32x16xf32>
    %24 = arith.mulf %23, %22 : vector<32x16xf32>
    %cst_18 = arith.constant -1.45315206 : f32
    %25 = vector.broadcast %cst_18 : f32 to vector<32x16xf32>
    %26 = arith.addf %24, %25 : vector<32x16xf32>
    %27 = arith.mulf %26, %22 : vector<32x16xf32>
    %cst_19 = arith.constant 1.42141378 : f32
    %28 = vector.broadcast %cst_19 : f32 to vector<32x16xf32>
    %29 = arith.addf %27, %28 : vector<32x16xf32>
    %30 = arith.mulf %29, %22 : vector<32x16xf32>
    %cst_20 = arith.constant -0.284496725 : f32
    %31 = vector.broadcast %cst_20 : f32 to vector<32x16xf32>
    %32 = arith.addf %30, %31 : vector<32x16xf32>
    %33 = arith.mulf %32, %22 : vector<32x16xf32>
    %cst_21 = arith.constant 0.254829586 : f32
    %34 = vector.broadcast %cst_21 : f32 to vector<32x16xf32>
    %35 = arith.addf %33, %34 : vector<32x16xf32>
    %36 = arith.mulf %35, %22 : vector<32x16xf32>
    %cst_22 = arith.constant 0.000000e+00 : f32
    %37 = vector.broadcast %cst_22 : f32 to vector<32x16xf32>
    %38 = arith.subf %37, %17 : vector<32x16xf32>
    %39 = arith.mulf %38, %17 : vector<32x16xf32>
    %40 = math.exp %39 : vector<32x16xf32>
    %41 = arith.mulf %36, %40 : vector<32x16xf32>
    %cst_23 = arith.constant 1.000000e+00 : f32
    %42 = vector.broadcast %cst_23 : f32 to vector<32x16xf32>
    %43 = arith.subf %42, %41 : vector<32x16xf32>
    %44 = arith.mulf %16, %43 : vector<32x16xf32>
    %cst_24 = arith.constant 1.000000e+00 : f32
    %45 = vector.broadcast %cst_24 : f32 to vector<32x16xf32>
    %46 = arith.addf %45, %44 : vector<32x16xf32>
    %47 = arith.mulf %9, %46 : vector<32x16xf32>
    %48 = vector.extract_strided_slice %0 {offsets = [0, 0], sizes = [1, 16], strides = [1, 1]} : vector<2x16xf32> to vector<1x16xf32>
    %49 = vector.broadcast %48 : vector<1x16xf32> to vector<32x16xf32>
    %50 = arith.mulf %47, %49 : vector<32x16xf32>
    %51 = vector.extract_strided_slice %0 {offsets = [1, 0], sizes = [1, 16], strides = [1, 1]} : vector<2x16xf32> to vector<1x16xf32>
    %52 = vector.broadcast %51 : vector<1x16xf32> to vector<32x16xf32>
    %53 = arith.addf %50, %52 : vector<32x16xf32>
    %c0_25 = arith.constant 0 : index
    %c0_26 = arith.constant 0 : index
    %c0_27 = arith.constant 0 : index
    %54 = vector.load %arg3[%c0_25, %c0_26, %c0_27] : memref<3x16x32xbf16, #tpu.memory_space<vmem>>, vector<3x16x32xbf16>
    %55 = arith.truncf %53 : vector<32x16xf32> to vector<32x16xbf16>
    %56 = tpu.iota {dimensions = array<i32: 0>} : vector<32x32xi32>
    %57 = tpu.iota {dimensions = array<i32: 1>} : vector<32x32xi32>
    %c1_i32 = arith.constant 1 : i32
    %58 = vector.broadcast %c1_i32 : i32 to vector<32x32xi32>
    %59 = arith.muli %56, %58 : vector<32x32xi32>
    %c-1_i32 = arith.constant -1 : i32
    %60 = vector.broadcast %c-1_i32 : i32 to vector<32x32xi32>
    %61 = arith.addi %59, %60 : vector<32x32xi32>
    %62 = arith.cmpi eq, %57, %61 : vector<32x32xi32>
    %cst_28 = arith.constant 1.000000e+00 : f32
    %cst_29 = arith.constant 0.000000e+00 : f32
    %63 = vector.broadcast %cst_28 : f32 to vector<32x32xf32>
    %64 = vector.broadcast %cst_29 : f32 to vector<32x32xf32>
    %65 = arith.select %62, %63, %64 : vector<32x32xi1>, vector<32x32xf32>
    %66 = arith.truncf %65 : vector<32x32xf32> to vector<32x32xbf16>
    %cst_30 = arith.constant dense<0.000000e+00> : vector<32x16xf32>
    %67 = tpu.matmul %66, %55, %cst_30 {dimension_numbers = #tpu.dot_dimension_numbers<[1], [0], [0], [1], [0, 0, 1, 1], [], []>} : vector<32x32xbf16>, vector<32x16xbf16>, vector<32x16xf32> -> vector<32x16xf32>
    %68 = arith.truncf %67 : vector<32x16xf32> to vector<32x16xbf16>
    %69 = vector.extract_strided_slice %54 {offsets = [0, 0, 0], sizes = [1, 16, 32], strides = [1, 1, 1]} : vector<3x16x32xbf16> to vector<1x16x32xbf16>
    %70 = vector.shape_cast %69 : vector<1x16x32xbf16> to vector<16x32xbf16>
    %cst_31 = arith.constant dense<0.000000e+00> : vector<32x32xf32>
    %71 = tpu.matmul %68, %70, %cst_31 {dimension_numbers = #tpu.dot_dimension_numbers<[1], [0], [0], [1], [0, 0, 1, 1], [], []>} : vector<32x16xbf16>, vector<16x32xbf16>, vector<32x32xf32> -> vector<32x32xf32>
    %c1_i32_32 = arith.constant 1 : i32
    %72 = vector.broadcast %c1_i32_32 : i32 to vector<32x32xi32>
    %73 = arith.muli %56, %72 : vector<32x32xi32>
    %c0_i32 = arith.constant 0 : i32
    %74 = vector.broadcast %c0_i32 : i32 to vector<32x32xi32>
    %75 = arith.addi %73, %74 : vector<32x32xi32>
    %76 = arith.cmpi eq, %57, %75 : vector<32x32xi32>
    %cst_33 = arith.constant 1.000000e+00 : f32
    %cst_34 = arith.constant 0.000000e+00 : f32
    %77 = vector.broadcast %cst_33 : f32 to vector<32x32xf32>
    %78 = vector.broadcast %cst_34 : f32 to vector<32x32xf32>
    %79 = arith.select %76, %77, %78 : vector<32x32xi1>, vector<32x32xf32>
    %80 = arith.truncf %79 : vector<32x32xf32> to vector<32x32xbf16>
    %cst_35 = arith.constant dense<0.000000e+00> : vector<32x16xf32>
    %81 = tpu.matmul %80, %55, %cst_35 {dimension_numbers = #tpu.dot_dimension_numbers<[1], [0], [0], [1], [0, 0, 1, 1], [], []>} : vector<32x32xbf16>, vector<32x16xbf16>, vector<32x16xf32> -> vector<32x16xf32>
    %82 = arith.truncf %81 : vector<32x16xf32> to vector<32x16xbf16>
    %83 = vector.extract_strided_slice %54 {offsets = [1, 0, 0], sizes = [1, 16, 32], strides = [1, 1, 1]} : vector<3x16x32xbf16> to vector<1x16x32xbf16>
    %84 = vector.shape_cast %83 : vector<1x16x32xbf16> to vector<16x32xbf16>
    %cst_36 = arith.constant dense<0.000000e+00> : vector<32x32xf32>
    %85 = tpu.matmul %82, %84, %cst_36 {dimension_numbers = #tpu.dot_dimension_numbers<[1], [0], [0], [1], [0, 0, 1, 1], [], []>} : vector<32x16xbf16>, vector<16x32xbf16>, vector<32x32xf32> -> vector<32x32xf32>
    %86 = arith.addf %71, %85 : vector<32x32xf32>
    %c1_i32_37 = arith.constant 1 : i32
    %87 = vector.broadcast %c1_i32_37 : i32 to vector<32x32xi32>
    %88 = arith.muli %56, %87 : vector<32x32xi32>
    %c1_i32_38 = arith.constant 1 : i32
    %89 = vector.broadcast %c1_i32_38 : i32 to vector<32x32xi32>
    %90 = arith.addi %88, %89 : vector<32x32xi32>
    %91 = arith.cmpi eq, %57, %90 : vector<32x32xi32>
    %cst_39 = arith.constant 1.000000e+00 : f32
    %cst_40 = arith.constant 0.000000e+00 : f32
    %92 = vector.broadcast %cst_39 : f32 to vector<32x32xf32>
    %93 = vector.broadcast %cst_40 : f32 to vector<32x32xf32>
    %94 = arith.select %91, %92, %93 : vector<32x32xi1>, vector<32x32xf32>
    %95 = arith.truncf %94 : vector<32x32xf32> to vector<32x32xbf16>
    %cst_41 = arith.constant dense<0.000000e+00> : vector<32x16xf32>
    %96 = tpu.matmul %95, %55, %cst_41 {dimension_numbers = #tpu.dot_dimension_numbers<[1], [0], [0], [1], [0, 0, 1, 1], [], []>} : vector<32x32xbf16>, vector<32x16xbf16>, vector<32x16xf32> -> vector<32x16xf32>
    %97 = arith.truncf %96 : vector<32x16xf32> to vector<32x16xbf16>
    %98 = vector.extract_strided_slice %54 {offsets = [2, 0, 0], sizes = [1, 16, 32], strides = [1, 1, 1]} : vector<3x16x32xbf16> to vector<1x16x32xbf16>
    %99 = vector.shape_cast %98 : vector<1x16x32xbf16> to vector<16x32xbf16>
    %cst_42 = arith.constant dense<0.000000e+00> : vector<32x32xf32>
    %100 = tpu.matmul %97, %99, %cst_42 {dimension_numbers = #tpu.dot_dimension_numbers<[1], [0], [0], [1], [0, 0, 1, 1], [], []>} : vector<32x16xbf16>, vector<16x32xbf16>, vector<32x32xf32> -> vector<32x32xf32>
    %101 = arith.addf %86, %100 : vector<32x32xf32>
    %cst_43 = arith.constant 5.000000e-01 : f32
    %102 = vector.broadcast %cst_43 : f32 to vector<32x32xf32>
    %103 = arith.mulf %102, %101 : vector<32x32xf32>
    %cst_44 = arith.constant 0.707106769 : f32
    %104 = vector.broadcast %cst_44 : f32 to vector<32x32xf32>
    %105 = arith.mulf %101, %104 : vector<32x32xf32>
    %cst_45 = arith.constant 0.000000e+00 : f32
    %106 = vector.broadcast %cst_45 : f32 to vector<32x32xf32>
    %107 = arith.cmpf olt, %105, %106 : vector<32x32xf32>
    %cst_46 = arith.constant -1.000000e+00 : f32
    %cst_47 = arith.constant 1.000000e+00 : f32
    %108 = vector.broadcast %cst_46 : f32 to vector<32x32xf32>
    %109 = vector.broadcast %cst_47 : f32 to vector<32x32xf32>
    %110 = arith.select %107, %108, %109 : vector<32x32xi1>, vector<32x32xf32>
    %111 = math.absf %105 : vector<32x32xf32>
    %cst_48 = arith.constant 0.327591091 : f32
    %112 = vector.broadcast %cst_48 : f32 to vector<32x32xf32>
    %113 = arith.mulf %112, %111 : vector<32x32xf32>
    %cst_49 = arith.constant 1.000000e+00 : f32
    %114 = vector.broadcast %cst_49 : f32 to vector<32x32xf32>
    %115 = arith.addf %114, %113 : vector<32x32xf32>
    %116 = tpu.reciprocal %115 {approx = true} : vector<32x32xf32> -> vector<32x32xf32>
    %cst_50 = arith.constant 1.06140542 : f32
    %117 = vector.broadcast %cst_50 : f32 to vector<32x32xf32>
    %118 = arith.mulf %117, %116 : vector<32x32xf32>
    %cst_51 = arith.constant -1.45315206 : f32
    %119 = vector.broadcast %cst_51 : f32 to vector<32x32xf32>
    %120 = arith.addf %118, %119 : vector<32x32xf32>
    %121 = arith.mulf %120, %116 : vector<32x32xf32>
    %cst_52 = arith.constant 1.42141378 : f32
    %122 = vector.broadcast %cst_52 : f32 to vector<32x32xf32>
    %123 = arith.addf %121, %122 : vector<32x32xf32>
    %124 = arith.mulf %123, %116 : vector<32x32xf32>
    %cst_53 = arith.constant -0.284496725 : f32
    %125 = vector.broadcast %cst_53 : f32 to vector<32x32xf32>
    %126 = arith.addf %124, %125 : vector<32x32xf32>
    %127 = arith.mulf %126, %116 : vector<32x32xf32>
    %cst_54 = arith.constant 0.254829586 : f32
    %128 = vector.broadcast %cst_54 : f32 to vector<32x32xf32>
    %129 = arith.addf %127, %128 : vector<32x32xf32>
    %130 = arith.mulf %129, %116 : vector<32x32xf32>
    %cst_55 = arith.constant 0.000000e+00 : f32
    %131 = vector.broadcast %cst_55 : f32 to vector<32x32xf32>
    %132 = arith.subf %131, %111 : vector<32x32xf32>
    %133 = arith.mulf %132, %111 : vector<32x32xf32>
    %134 = math.exp %133 : vector<32x32xf32>
    %135 = arith.mulf %130, %134 : vector<32x32xf32>
    %cst_56 = arith.constant 1.000000e+00 : f32
    %136 = vector.broadcast %cst_56 : f32 to vector<32x32xf32>
    %137 = arith.subf %136, %135 : vector<32x32xf32>
    %138 = arith.mulf %110, %137 : vector<32x32xf32>
    %cst_57 = arith.constant 1.000000e+00 : f32
    %139 = vector.broadcast %cst_57 : f32 to vector<32x32xf32>
    %140 = arith.addf %139, %138 : vector<32x32xf32>
    %141 = arith.mulf %103, %140 : vector<32x32xf32>
    %142 = vector.extract_strided_slice %1 {offsets = [0, 0], sizes = [1, 32], strides = [1, 1]} : vector<2x32xf32> to vector<1x32xf32>
    %143 = vector.broadcast %142 : vector<1x32xf32> to vector<32x32xf32>
    %144 = arith.mulf %141, %143 : vector<32x32xf32>
    %145 = vector.extract_strided_slice %1 {offsets = [1, 0], sizes = [1, 32], strides = [1, 1]} : vector<2x32xf32> to vector<1x32xf32>
    %146 = vector.broadcast %145 : vector<1x32xf32> to vector<32x32xf32>
    %147 = arith.addf %144, %146 : vector<32x32xf32>
    %c0_58 = arith.constant 0 : index
    %c0_59 = arith.constant 0 : index
    %c0_60 = arith.constant 0 : index
    %148 = vector.load %arg4[%c0_58, %c0_59, %c0_60] : memref<3x32x32xbf16, #tpu.memory_space<vmem>>, vector<3x32x32xbf16>
    %149 = arith.truncf %147 : vector<32x32xf32> to vector<32x32xbf16>
    %150 = tpu.iota {dimensions = array<i32: 0>} : vector<16x32xi32>
    %151 = tpu.iota {dimensions = array<i32: 1>} : vector<16x32xi32>
    %c2_i32 = arith.constant 2 : i32
    %152 = vector.broadcast %c2_i32 : i32 to vector<16x32xi32>
    %153 = arith.muli %150, %152 : vector<16x32xi32>
    %c-1_i32_61 = arith.constant -1 : i32
    %154 = vector.broadcast %c-1_i32_61 : i32 to vector<16x32xi32>
    %155 = arith.addi %153, %154 : vector<16x32xi32>
    %156 = arith.cmpi eq, %151, %155 : vector<16x32xi32>
    %cst_62 = arith.constant 1.000000e+00 : f32
    %cst_63 = arith.constant 0.000000e+00 : f32
    %157 = vector.broadcast %cst_62 : f32 to vector<16x32xf32>
    %158 = vector.broadcast %cst_63 : f32 to vector<16x32xf32>
    %159 = arith.select %156, %157, %158 : vector<16x32xi1>, vector<16x32xf32>
    %160 = arith.truncf %159 : vector<16x32xf32> to vector<16x32xbf16>
    %cst_64 = arith.constant dense<0.000000e+00> : vector<16x32xf32>
    %161 = tpu.matmul %160, %149, %cst_64 {dimension_numbers = #tpu.dot_dimension_numbers<[1], [0], [0], [1], [0, 0, 1, 1], [], []>} : vector<16x32xbf16>, vector<32x32xbf16>, vector<16x32xf32> -> vector<16x32xf32>
    %162 = arith.truncf %161 : vector<16x32xf32> to vector<16x32xbf16>
    %163 = vector.extract_strided_slice %148 {offsets = [0, 0, 0], sizes = [1, 32, 32], strides = [1, 1, 1]} : vector<3x32x32xbf16> to vector<1x32x32xbf16>
    %164 = vector.shape_cast %163 : vector<1x32x32xbf16> to vector<32x32xbf16>
    %cst_65 = arith.constant dense<0.000000e+00> : vector<16x32xf32>
    %165 = tpu.matmul %162, %164, %cst_65 {dimension_numbers = #tpu.dot_dimension_numbers<[1], [0], [0], [1], [0, 0, 1, 1], [], []>} : vector<16x32xbf16>, vector<32x32xbf16>, vector<16x32xf32> -> vector<16x32xf32>
    %c2_i32_66 = arith.constant 2 : i32
    %166 = vector.broadcast %c2_i32_66 : i32 to vector<16x32xi32>
    %167 = arith.muli %150, %166 : vector<16x32xi32>
    %c0_i32_67 = arith.constant 0 : i32
    %168 = vector.broadcast %c0_i32_67 : i32 to vector<16x32xi32>
    %169 = arith.addi %167, %168 : vector<16x32xi32>
    %170 = arith.cmpi eq, %151, %169 : vector<16x32xi32>
    %cst_68 = arith.constant 1.000000e+00 : f32
    %cst_69 = arith.constant 0.000000e+00 : f32
    %171 = vector.broadcast %cst_68 : f32 to vector<16x32xf32>
    %172 = vector.broadcast %cst_69 : f32 to vector<16x32xf32>
    %173 = arith.select %170, %171, %172 : vector<16x32xi1>, vector<16x32xf32>
    %174 = arith.truncf %173 : vector<16x32xf32> to vector<16x32xbf16>
    %cst_70 = arith.constant dense<0.000000e+00> : vector<16x32xf32>
    %175 = tpu.matmul %174, %149, %cst_70 {dimension_numbers = #tpu.dot_dimension_numbers<[1], [0], [0], [1], [0, 0, 1, 1], [], []>} : vector<16x32xbf16>, vector<32x32xbf16>, vector<16x32xf32> -> vector<16x32xf32>
    %176 = arith.truncf %175 : vector<16x32xf32> to vector<16x32xbf16>
    %177 = vector.extract_strided_slice %148 {offsets = [1, 0, 0], sizes = [1, 32, 32], strides = [1, 1, 1]} : vector<3x32x32xbf16> to vector<1x32x32xbf16>
    %178 = vector.shape_cast %177 : vector<1x32x32xbf16> to vector<32x32xbf16>
    %cst_71 = arith.constant dense<0.000000e+00> : vector<16x32xf32>
    %179 = tpu.matmul %176, %178, %cst_71 {dimension_numbers = #tpu.dot_dimension_numbers<[1], [0], [0], [1], [0, 0, 1, 1], [], []>} : vector<16x32xbf16>, vector<32x32xbf16>, vector<16x32xf32> -> vector<16x32xf32>
    %180 = arith.addf %165, %179 : vector<16x32xf32>
    %c2_i32_72 = arith.constant 2 : i32
    %181 = vector.broadcast %c2_i32_72 : i32 to vector<16x32xi32>
    %182 = arith.muli %150, %181 : vector<16x32xi32>
    %c1_i32_73 = arith.constant 1 : i32
    %183 = vector.broadcast %c1_i32_73 : i32 to vector<16x32xi32>
    %184 = arith.addi %182, %183 : vector<16x32xi32>
    %185 = arith.cmpi eq, %151, %184 : vector<16x32xi32>
    %cst_74 = arith.constant 1.000000e+00 : f32
    %cst_75 = arith.constant 0.000000e+00 : f32
    %186 = vector.broadcast %cst_74 : f32 to vector<16x32xf32>
    %187 = vector.broadcast %cst_75 : f32 to vector<16x32xf32>
    %188 = arith.select %185, %186, %187 : vector<16x32xi1>, vector<16x32xf32>
    %189 = arith.truncf %188 : vector<16x32xf32> to vector<16x32xbf16>
    %cst_76 = arith.constant dense<0.000000e+00> : vector<16x32xf32>
    %190 = tpu.matmul %189, %149, %cst_76 {dimension_numbers = #tpu.dot_dimension_numbers<[1], [0], [0], [1], [0, 0, 1, 1], [], []>} : vector<16x32xbf16>, vector<32x32xbf16>, vector<16x32xf32> -> vector<16x32xf32>
    %191 = arith.truncf %190 : vector<16x32xf32> to vector<16x32xbf16>
    %192 = vector.extract_strided_slice %148 {offsets = [2, 0, 0], sizes = [1, 32, 32], strides = [1, 1, 1]} : vector<3x32x32xbf16> to vector<1x32x32xbf16>
    %193 = vector.shape_cast %192 : vector<1x32x32xbf16> to vector<32x32xbf16>
    %cst_77 = arith.constant dense<0.000000e+00> : vector<16x32xf32>
    %194 = tpu.matmul %191, %193, %cst_77 {dimension_numbers = #tpu.dot_dimension_numbers<[1], [0], [0], [1], [0, 0, 1, 1], [], []>} : vector<16x32xbf16>, vector<32x32xbf16>, vector<16x32xf32> -> vector<16x32xf32>
    %195 = arith.addf %180, %194 : vector<16x32xf32>
    %cst_78 = arith.constant 5.000000e-01 : f32
    %196 = vector.broadcast %cst_78 : f32 to vector<16x32xf32>
    %197 = arith.mulf %196, %195 : vector<16x32xf32>
    %cst_79 = arith.constant 0.707106769 : f32
    %198 = vector.broadcast %cst_79 : f32 to vector<16x32xf32>
    %199 = arith.mulf %195, %198 : vector<16x32xf32>
    %cst_80 = arith.constant 0.000000e+00 : f32
    %200 = vector.broadcast %cst_80 : f32 to vector<16x32xf32>
    %201 = arith.cmpf olt, %199, %200 : vector<16x32xf32>
    %cst_81 = arith.constant -1.000000e+00 : f32
    %cst_82 = arith.constant 1.000000e+00 : f32
    %202 = vector.broadcast %cst_81 : f32 to vector<16x32xf32>
    %203 = vector.broadcast %cst_82 : f32 to vector<16x32xf32>
    %204 = arith.select %201, %202, %203 : vector<16x32xi1>, vector<16x32xf32>
    %205 = math.absf %199 : vector<16x32xf32>
    %cst_83 = arith.constant 0.327591091 : f32
    %206 = vector.broadcast %cst_83 : f32 to vector<16x32xf32>
    %207 = arith.mulf %206, %205 : vector<16x32xf32>
    %cst_84 = arith.constant 1.000000e+00 : f32
    %208 = vector.broadcast %cst_84 : f32 to vector<16x32xf32>
    %209 = arith.addf %208, %207 : vector<16x32xf32>
    %210 = tpu.reciprocal %209 {approx = true} : vector<16x32xf32> -> vector<16x32xf32>
    %cst_85 = arith.constant 1.06140542 : f32
    %211 = vector.broadcast %cst_85 : f32 to vector<16x32xf32>
    %212 = arith.mulf %211, %210 : vector<16x32xf32>
    %cst_86 = arith.constant -1.45315206 : f32
    %213 = vector.broadcast %cst_86 : f32 to vector<16x32xf32>
    %214 = arith.addf %212, %213 : vector<16x32xf32>
    %215 = arith.mulf %214, %210 : vector<16x32xf32>
    %cst_87 = arith.constant 1.42141378 : f32
    %216 = vector.broadcast %cst_87 : f32 to vector<16x32xf32>
    %217 = arith.addf %215, %216 : vector<16x32xf32>
    %218 = arith.mulf %217, %210 : vector<16x32xf32>
    %cst_88 = arith.constant -0.284496725 : f32
    %219 = vector.broadcast %cst_88 : f32 to vector<16x32xf32>
    %220 = arith.addf %218, %219 : vector<16x32xf32>
    %221 = arith.mulf %220, %210 : vector<16x32xf32>
    %cst_89 = arith.constant 0.254829586 : f32
    %222 = vector.broadcast %cst_89 : f32 to vector<16x32xf32>
    %223 = arith.addf %221, %222 : vector<16x32xf32>
    %224 = arith.mulf %223, %210 : vector<16x32xf32>
    %cst_90 = arith.constant 0.000000e+00 : f32
    %225 = vector.broadcast %cst_90 : f32 to vector<16x32xf32>
    %226 = arith.subf %225, %205 : vector<16x32xf32>
    %227 = arith.mulf %226, %205 : vector<16x32xf32>
    %228 = math.exp %227 : vector<16x32xf32>
    %229 = arith.mulf %224, %228 : vector<16x32xf32>
    %cst_91 = arith.constant 1.000000e+00 : f32
    %230 = vector.broadcast %cst_91 : f32 to vector<16x32xf32>
    %231 = arith.subf %230, %229 : vector<16x32xf32>
    %232 = arith.mulf %204, %231 : vector<16x32xf32>
    %cst_92 = arith.constant 1.000000e+00 : f32
    %233 = vector.broadcast %cst_92 : f32 to vector<16x32xf32>
    %234 = arith.addf %233, %232 : vector<16x32xf32>
    %235 = arith.mulf %197, %234 : vector<16x32xf32>
    %236 = vector.extract_strided_slice %2 {offsets = [0, 0], sizes = [1, 32], strides = [1, 1]} : vector<2x32xf32> to vector<1x32xf32>
    %237 = vector.broadcast %236 : vector<1x32xf32> to vector<16x32xf32>
    %238 = arith.mulf %235, %237 : vector<16x32xf32>
    %239 = vector.extract_strided_slice %2 {offsets = [1, 0], sizes = [1, 32], strides = [1, 1]} : vector<2x32xf32> to vector<1x32xf32>
    %240 = vector.broadcast %239 : vector<1x32xf32> to vector<16x32xf32>
    %241 = arith.addf %238, %240 : vector<16x32xf32>
    %c0_93 = arith.constant 0 : index
    %c0_94 = arith.constant 0 : index
    %c0_95 = arith.constant 0 : index
    %242 = vector.load %arg8[%c0_93, %c0_94, %c0_95] : memref<1x16x32xf32, #tpu.memory_space<vmem>>, vector<1x16x32xf32>
    %243 = vector.shape_cast %242 : vector<1x16x32xf32> to vector<16x32xf32>
    %244 = vector.shape_cast %241 : vector<16x32xf32> to vector<1x16x32xf32>
    tpu.vector_store %arg8[%c0_93, %c0_94, %c0_95], %244 {strides = array<i32>} : memref<1x16x32xf32, #tpu.memory_space<vmem>>, vector<1x16x32xf32>,
    return
  }
  func.func @transform_0(%arg0: i32) -> (i32, i32, i32) {
    %c0_i32 = arith.constant 0 : i32
    %c0_i32_0 = arith.constant 0 : i32
    %c0_i32_1 = arith.constant 0 : i32
    return %arg0, %c0_i32, %c0_i32_0 : i32, i32, i32
  }
  func.func @transform_1(%arg0: i32) -> (i32, i32) {
    %c0_i32 = arith.constant 0 : i32
    %c0_i32_0 = arith.constant 0 : i32
    %c0_i32_1 = arith.constant 0 : i32
    return %c0_i32, %c0_i32_0 : i32, i32
  }
  func.func @transform_2(%arg0: i32) -> (i32, i32, i32) {
    %c0_i32 = arith.constant 0 : i32
    %c0_i32_0 = arith.constant 0 : i32
    %c0_i32_1 = arith.constant 0 : i32
    %c0_i32_2 = arith.constant 0 : i32
    return %c0_i32, %c0_i32_0, %c0_i32_1 : i32, i32, i32
  }
  func.func @transform_3(%arg0: i32) -> (i32, i32, i32) {
    %c0_i32 = arith.constant 0 : i32
    %c0_i32_0 = arith.constant 0 : i32
    %c0_i32_1 = arith.constant 0 : i32
    %c0_i32_2 = arith.constant 0 : i32
    return %c0_i32, %c0_i32_0, %c0_i32_1 : i32, i32, i32
  }
  func.func @transform_4(%arg0: i32) -> (i32, i32) {
    %c0_i32 = arith.constant 0 : i32
    %c0_i32_0 = arith.constant 0 : i32
    %c0_i32_1 = arith.constant 0 : i32
    return %c0_i32, %c0_i32_0 : i32, i32
  }
  func.func @transform_5(%arg0: i32) -> (i32, i32) {
    %c0_i32 = arith.constant 0 : i32
    %c0_i32_0 = arith.constant 0 : i32
    %c0_i32_1 = arith.constant 0 : i32
    return %c0_i32, %c0_i32_0 : i32, i32
  }
  func.func @transform_6(%arg0: i32) -> (i32, i32) {
    %c0_i32 = arith.constant 0 : i32
    %c0_i32_0 = arith.constant 0 : i32
    %c0_i32_1 = arith.constant 0 : i32
    return %c0_i32, %c0_i32_0 : i32, i32
  }
  func.func @transform_7(%arg0: i32) -> (i32, i32, i32) {
    %c0_i32 = arith.constant 0 : i32
    %c0_i32_0 = arith.constant 0 : i32
    %c0_i32_1 = arith.constant 0 : i32
    return %arg0, %c0_i32, %c0_i32_0 : i32, i32, i32
  }
}

module attributes {stable_mosaic.version = 11 : i64} {
  func.func @_block_kernel(%arg0: i32, %arg1: memref<1x16x32xf32, #tpu.memory_space<vmem>>, %arg2: memref<2x32xf32, #tpu.memory_space<vmem>>, %arg3: memref<32x96xbf16, #tpu.memory_space<vmem>>, %arg4: memref<32x32xbf16, #tpu.memory_space<vmem>>, %arg5: memref<2x32xf32, #tpu.memory_space<vmem>>, %arg6: memref<32x128xbf16, #tpu.memory_space<vmem>>, %arg7: memref<1x128xf32, #tpu.memory_space<vmem>>, %arg8: memref<128x32xbf16, #tpu.memory_space<vmem>>, %arg9: memref<1x32xf32, #tpu.memory_space<vmem>>, %arg10: memref<1x16x32xf32, #tpu.memory_space<vmem>>) attributes {dimension_semantics = [#tpu.dimension_semantics<parallel>], iteration_bounds = array<i64: 2>, scalar_prefetch = 0 : i64, scratch_operands = 0 : i64, tpu.core_type = #tpu.core_type<tc>, window_params = [{transform_indices = @transform_0, window_bounds = array<i64: 1, 16, 32>}, {pipeline_mode = #tpu.pipeline_mode<synchronous>, transform_indices = @transform_1, window_bounds = array<i64: 2, 32>}, {pipeline_mode = #tpu.pipeline_mode<synchronous>, transform_indices = @transform_2, window_bounds = array<i64: 32, 96>}, {pipeline_mode = #tpu.pipeline_mode<synchronous>, transform_indices = @transform_3, window_bounds = array<i64: 32, 32>}, {pipeline_mode = #tpu.pipeline_mode<synchronous>, transform_indices = @transform_4, window_bounds = array<i64: 2, 32>}, {pipeline_mode = #tpu.pipeline_mode<synchronous>, transform_indices = @transform_5, window_bounds = array<i64: 32, 128>}, {pipeline_mode = #tpu.pipeline_mode<synchronous>, transform_indices = @transform_6, window_bounds = array<i64: 1, 128>}, {pipeline_mode = #tpu.pipeline_mode<synchronous>, transform_indices = @transform_7, window_bounds = array<i64: 128, 32>}, {pipeline_mode = #tpu.pipeline_mode<synchronous>, transform_indices = @transform_8, window_bounds = array<i64: 1, 32>}, {transform_indices = @transform_9, window_bounds = array<i64: 1, 16, 32>}]} {
    %c0 = arith.constant 0 : index
    %c0_0 = arith.constant 0 : index
    %c0_1 = arith.constant 0 : index
    %0 = vector.load %arg1[%c0, %c0_0, %c0_1] : memref<1x16x32xf32, #tpu.memory_space<vmem>>, vector<1x16x32xf32>
    %1 = vector.shape_cast %0 : vector<1x16x32xf32> to vector<16x32xf32>
    %c0_2 = arith.constant 0 : index
    %c0_3 = arith.constant 0 : index
    %2 = vector.load %arg2[%c0_2, %c0_3] : memref<2x32xf32, #tpu.memory_space<vmem>>, vector<2x32xf32>
    %c0_4 = arith.constant 0 : index
    %c0_5 = arith.constant 0 : index
    %3 = vector.load %arg5[%c0_4, %c0_5] : memref<2x32xf32, #tpu.memory_space<vmem>>, vector<2x32xf32>
    %c0_6 = arith.constant 0 : index
    %c0_7 = arith.constant 0 : index
    %4 = vector.load %arg4[%c0_6, %c0_7] : memref<32x32xbf16, #tpu.memory_space<vmem>>, vector<32x32xbf16>
    %5 = vector.extract_strided_slice %2 {offsets = [0, 0], sizes = [1, 32], strides = [1, 1]} : vector<2x32xf32> to vector<1x32xf32>
    %6 = vector.extract_strided_slice %2 {offsets = [1, 0], sizes = [1, 32], strides = [1, 1]} : vector<2x32xf32> to vector<1x32xf32>
    %cst = arith.constant dense<0.000000e+00> : vector<16xf32>
    %7 = vector.multi_reduction <add>, %1, %cst [1] : vector<16x32xf32> to vector<16xf32>
    %8 = vector.shape_cast %7 : vector<16xf32> to vector<16x1xf32>
    %cst_8 = arith.constant 3.200000e+01 : f32
    %9 = vector.broadcast %cst_8 : f32 to vector<16x1xf32>
    %10 = arith.divf %8, %9 : vector<16x1xf32>
    %11 = vector.broadcast %10 : vector<16x1xf32> to vector<16x32xf32>
    %12 = arith.subf %1, %11 : vector<16x32xf32>
    %13 = arith.mulf %12, %12 : vector<16x32xf32>
    %cst_9 = arith.constant dense<0.000000e+00> : vector<16xf32>
    %14 = vector.multi_reduction <add>, %13, %cst_9 [1] : vector<16x32xf32> to vector<16xf32>
    %15 = vector.shape_cast %14 : vector<16xf32> to vector<16x1xf32>
    %cst_10 = arith.constant 3.200000e+01 : f32
    %16 = vector.broadcast %cst_10 : f32 to vector<16x1xf32>
    %17 = arith.divf %15, %16 : vector<16x1xf32>
    %cst_11 = arith.constant 9.99999974E-6 : f32
    %18 = vector.broadcast %cst_11 : f32 to vector<16x1xf32>
    %19 = arith.addf %17, %18 : vector<16x1xf32>
    %20 = math.rsqrt %19 : vector<16x1xf32>
    %21 = vector.broadcast %20 : vector<16x1xf32> to vector<16x32xf32>
    %22 = arith.mulf %12, %21 : vector<16x32xf32>
    %23 = vector.broadcast %5 : vector<1x32xf32> to vector<16x32xf32>
    %24 = arith.mulf %22, %23 : vector<16x32xf32>
    %25 = vector.broadcast %6 : vector<1x32xf32> to vector<16x32xf32>
    %26 = arith.addf %24, %25 : vector<16x32xf32>
    %27 = arith.truncf %26 : vector<16x32xf32> to vector<16x32xbf16>
    %c0_12 = arith.constant 0 : index
    %c0_13 = arith.constant 0 : index
    %28 = vector.load %arg3[%c0_12, %c0_13] : memref<32x96xbf16, #tpu.memory_space<vmem>>, vector<32x96xbf16>
    %cst_14 = arith.constant dense<0.000000e+00> : vector<16x96xf32>
    %29 = tpu.matmul %27, %28, %cst_14 {dimension_numbers = #tpu.dot_dimension_numbers<[1], [0], [0], [1], [0, 0, 1, 1], [], []>} : vector<16x32xbf16>, vector<32x96xbf16>, vector<16x96xf32> -> vector<16x96xf32>
    %30 = vector.extract_strided_slice %29 {offsets = [0, 0], sizes = [16, 8], strides = [1, 1]} : vector<16x96xf32> to vector<16x8xf32>
    %31 = arith.truncf %30 : vector<16x8xf32> to vector<16x8xbf16>
    %32 = vector.extract_strided_slice %29 {offsets = [0, 32], sizes = [16, 8], strides = [1, 1]} : vector<16x96xf32> to vector<16x8xf32>
    %33 = arith.truncf %32 : vector<16x8xf32> to vector<16x8xbf16>
    %34 = vector.extract_strided_slice %29 {offsets = [0, 64], sizes = [16, 8], strides = [1, 1]} : vector<16x96xf32> to vector<16x8xf32>
    %35 = arith.truncf %34 : vector<16x8xf32> to vector<16x8xbf16>
    %cst_15 = arith.constant dense<0.000000e+00> : vector<16x16xf32>
    %36 = tpu.matmul %31, %33, %cst_15 {dimension_numbers = #tpu.dot_dimension_numbers<[1], [1], [0], [0], [0, 0, 1, 0], [], []>} : vector<16x8xbf16>, vector<16x8xbf16>, vector<16x16xf32> -> vector<16x16xf32>
    %cst_16 = arith.constant 0.353553385 : f32
    %37 = vector.broadcast %cst_16 : f32 to vector<16x16xf32>
    %38 = arith.mulf %36, %37 : vector<16x16xf32>
    %cst_17 = arith.constant dense<0xFF800000> : vector<16xf32>
    %39 = vector.multi_reduction <maximumf>, %38, %cst_17 [1] : vector<16x16xf32> to vector<16xf32>
    %40 = vector.shape_cast %39 : vector<16xf32> to vector<16x1xf32>
    %41 = vector.broadcast %40 : vector<16x1xf32> to vector<16x16xf32>
    %42 = arith.subf %38, %41 : vector<16x16xf32>
    %43 = math.exp %42 : vector<16x16xf32>
    %cst_18 = arith.constant dense<0.000000e+00> : vector<16xf32>
    %44 = vector.multi_reduction <add>, %43, %cst_18 [1] : vector<16x16xf32> to vector<16xf32>
    %45 = vector.shape_cast %44 : vector<16xf32> to vector<16x1xf32>
    %46 = tpu.reciprocal %45 {approx = true} : vector<16x1xf32> -> vector<16x1xf32>
    %47 = vector.broadcast %46 : vector<16x1xf32> to vector<16x16xf32>
    %48 = arith.mulf %43, %47 : vector<16x16xf32>
    %49 = arith.truncf %48 : vector<16x16xf32> to vector<16x16xbf16>
    %cst_19 = arith.constant dense<0.000000e+00> : vector<16x8xf32>
    %50 = tpu.matmul %49, %35, %cst_19 {dimension_numbers = #tpu.dot_dimension_numbers<[1], [0], [0], [1], [0, 0, 1, 1], [], []>} : vector<16x16xbf16>, vector<16x8xbf16>, vector<16x8xf32> -> vector<16x8xf32>
    %51 = arith.truncf %50 : vector<16x8xf32> to vector<16x8xbf16>
    %52 = vector.extract_strided_slice %4 {offsets = [0, 0], sizes = [8, 32], strides = [1, 1]} : vector<32x32xbf16> to vector<8x32xbf16>
    %cst_20 = arith.constant dense<0.000000e+00> : vector<16x32xf32>
    %53 = tpu.matmul %51, %52, %cst_20 {dimension_numbers = #tpu.dot_dimension_numbers<[1], [0], [0], [1], [0, 0, 1, 1], [], []>} : vector<16x8xbf16>, vector<8x32xbf16>, vector<16x32xf32> -> vector<16x32xf32>
    %54 = vector.extract_strided_slice %29 {offsets = [0, 8], sizes = [16, 8], strides = [1, 1]} : vector<16x96xf32> to vector<16x8xf32>
    %55 = arith.truncf %54 : vector<16x8xf32> to vector<16x8xbf16>
    %56 = vector.extract_strided_slice %29 {offsets = [0, 40], sizes = [16, 8], strides = [1, 1]} : vector<16x96xf32> to vector<16x8xf32>
    %57 = arith.truncf %56 : vector<16x8xf32> to vector<16x8xbf16>
    %58 = vector.extract_strided_slice %29 {offsets = [0, 72], sizes = [16, 8], strides = [1, 1]} : vector<16x96xf32> to vector<16x8xf32>
    %59 = arith.truncf %58 : vector<16x8xf32> to vector<16x8xbf16>
    %cst_21 = arith.constant dense<0.000000e+00> : vector<16x16xf32>
    %60 = tpu.matmul %55, %57, %cst_21 {dimension_numbers = #tpu.dot_dimension_numbers<[1], [1], [0], [0], [0, 0, 1, 0], [], []>} : vector<16x8xbf16>, vector<16x8xbf16>, vector<16x16xf32> -> vector<16x16xf32>
    %cst_22 = arith.constant 0.353553385 : f32
    %61 = vector.broadcast %cst_22 : f32 to vector<16x16xf32>
    %62 = arith.mulf %60, %61 : vector<16x16xf32>
    %cst_23 = arith.constant dense<0xFF800000> : vector<16xf32>
    %63 = vector.multi_reduction <maximumf>, %62, %cst_23 [1] : vector<16x16xf32> to vector<16xf32>
    %64 = vector.shape_cast %63 : vector<16xf32> to vector<16x1xf32>
    %65 = vector.broadcast %64 : vector<16x1xf32> to vector<16x16xf32>
    %66 = arith.subf %62, %65 : vector<16x16xf32>
    %67 = math.exp %66 : vector<16x16xf32>
    %cst_24 = arith.constant dense<0.000000e+00> : vector<16xf32>
    %68 = vector.multi_reduction <add>, %67, %cst_24 [1] : vector<16x16xf32> to vector<16xf32>
    %69 = vector.shape_cast %68 : vector<16xf32> to vector<16x1xf32>
    %70 = tpu.reciprocal %69 {approx = true} : vector<16x1xf32> -> vector<16x1xf32>
    %71 = vector.broadcast %70 : vector<16x1xf32> to vector<16x16xf32>
    %72 = arith.mulf %67, %71 : vector<16x16xf32>
    %73 = arith.truncf %72 : vector<16x16xf32> to vector<16x16xbf16>
    %cst_25 = arith.constant dense<0.000000e+00> : vector<16x8xf32>
    %74 = tpu.matmul %73, %59, %cst_25 {dimension_numbers = #tpu.dot_dimension_numbers<[1], [0], [0], [1], [0, 0, 1, 1], [], []>} : vector<16x16xbf16>, vector<16x8xbf16>, vector<16x8xf32> -> vector<16x8xf32>
    %75 = arith.truncf %74 : vector<16x8xf32> to vector<16x8xbf16>
    %76 = vector.extract_strided_slice %4 {offsets = [8, 0], sizes = [8, 32], strides = [1, 1]} : vector<32x32xbf16> to vector<8x32xbf16>
    %cst_26 = arith.constant dense<0.000000e+00> : vector<16x32xf32>
    %77 = tpu.matmul %75, %76, %cst_26 {dimension_numbers = #tpu.dot_dimension_numbers<[1], [0], [0], [1], [0, 0, 1, 1], [], []>} : vector<16x8xbf16>, vector<8x32xbf16>, vector<16x32xf32> -> vector<16x32xf32>
    %78 = arith.addf %53, %77 : vector<16x32xf32>
    %79 = vector.extract_strided_slice %29 {offsets = [0, 16], sizes = [16, 8], strides = [1, 1]} : vector<16x96xf32> to vector<16x8xf32>
    %80 = arith.truncf %79 : vector<16x8xf32> to vector<16x8xbf16>
    %81 = vector.extract_strided_slice %29 {offsets = [0, 48], sizes = [16, 8], strides = [1, 1]} : vector<16x96xf32> to vector<16x8xf32>
    %82 = arith.truncf %81 : vector<16x8xf32> to vector<16x8xbf16>
    %83 = vector.extract_strided_slice %29 {offsets = [0, 80], sizes = [16, 8], strides = [1, 1]} : vector<16x96xf32> to vector<16x8xf32>
    %84 = arith.truncf %83 : vector<16x8xf32> to vector<16x8xbf16>
    %cst_27 = arith.constant dense<0.000000e+00> : vector<16x16xf32>
    %85 = tpu.matmul %80, %82, %cst_27 {dimension_numbers = #tpu.dot_dimension_numbers<[1], [1], [0], [0], [0, 0, 1, 0], [], []>} : vector<16x8xbf16>, vector<16x8xbf16>, vector<16x16xf32> -> vector<16x16xf32>
    %cst_28 = arith.constant 0.353553385 : f32
    %86 = vector.broadcast %cst_28 : f32 to vector<16x16xf32>
    %87 = arith.mulf %85, %86 : vector<16x16xf32>
    %cst_29 = arith.constant dense<0xFF800000> : vector<16xf32>
    %88 = vector.multi_reduction <maximumf>, %87, %cst_29 [1] : vector<16x16xf32> to vector<16xf32>
    %89 = vector.shape_cast %88 : vector<16xf32> to vector<16x1xf32>
    %90 = vector.broadcast %89 : vector<16x1xf32> to vector<16x16xf32>
    %91 = arith.subf %87, %90 : vector<16x16xf32>
    %92 = math.exp %91 : vector<16x16xf32>
    %cst_30 = arith.constant dense<0.000000e+00> : vector<16xf32>
    %93 = vector.multi_reduction <add>, %92, %cst_30 [1] : vector<16x16xf32> to vector<16xf32>
    %94 = vector.shape_cast %93 : vector<16xf32> to vector<16x1xf32>
    %95 = tpu.reciprocal %94 {approx = true} : vector<16x1xf32> -> vector<16x1xf32>
    %96 = vector.broadcast %95 : vector<16x1xf32> to vector<16x16xf32>
    %97 = arith.mulf %92, %96 : vector<16x16xf32>
    %98 = arith.truncf %97 : vector<16x16xf32> to vector<16x16xbf16>
    %cst_31 = arith.constant dense<0.000000e+00> : vector<16x8xf32>
    %99 = tpu.matmul %98, %84, %cst_31 {dimension_numbers = #tpu.dot_dimension_numbers<[1], [0], [0], [1], [0, 0, 1, 1], [], []>} : vector<16x16xbf16>, vector<16x8xbf16>, vector<16x8xf32> -> vector<16x8xf32>
    %100 = arith.truncf %99 : vector<16x8xf32> to vector<16x8xbf16>
    %101 = vector.extract_strided_slice %4 {offsets = [16, 0], sizes = [8, 32], strides = [1, 1]} : vector<32x32xbf16> to vector<8x32xbf16>
    %cst_32 = arith.constant dense<0.000000e+00> : vector<16x32xf32>
    %102 = tpu.matmul %100, %101, %cst_32 {dimension_numbers = #tpu.dot_dimension_numbers<[1], [0], [0], [1], [0, 0, 1, 1], [], []>} : vector<16x8xbf16>, vector<8x32xbf16>, vector<16x32xf32> -> vector<16x32xf32>
    %103 = arith.addf %78, %102 : vector<16x32xf32>
    %104 = vector.extract_strided_slice %29 {offsets = [0, 24], sizes = [16, 8], strides = [1, 1]} : vector<16x96xf32> to vector<16x8xf32>
    %105 = arith.truncf %104 : vector<16x8xf32> to vector<16x8xbf16>
    %106 = vector.extract_strided_slice %29 {offsets = [0, 56], sizes = [16, 8], strides = [1, 1]} : vector<16x96xf32> to vector<16x8xf32>
    %107 = arith.truncf %106 : vector<16x8xf32> to vector<16x8xbf16>
    %108 = vector.extract_strided_slice %29 {offsets = [0, 88], sizes = [16, 8], strides = [1, 1]} : vector<16x96xf32> to vector<16x8xf32>
    %109 = arith.truncf %108 : vector<16x8xf32> to vector<16x8xbf16>
    %cst_33 = arith.constant dense<0.000000e+00> : vector<16x16xf32>
    %110 = tpu.matmul %105, %107, %cst_33 {dimension_numbers = #tpu.dot_dimension_numbers<[1], [1], [0], [0], [0, 0, 1, 0], [], []>} : vector<16x8xbf16>, vector<16x8xbf16>, vector<16x16xf32> -> vector<16x16xf32>
    %cst_34 = arith.constant 0.353553385 : f32
    %111 = vector.broadcast %cst_34 : f32 to vector<16x16xf32>
    %112 = arith.mulf %110, %111 : vector<16x16xf32>
    %cst_35 = arith.constant dense<0xFF800000> : vector<16xf32>
    %113 = vector.multi_reduction <maximumf>, %112, %cst_35 [1] : vector<16x16xf32> to vector<16xf32>
    %114 = vector.shape_cast %113 : vector<16xf32> to vector<16x1xf32>
    %115 = vector.broadcast %114 : vector<16x1xf32> to vector<16x16xf32>
    %116 = arith.subf %112, %115 : vector<16x16xf32>
    %117 = math.exp %116 : vector<16x16xf32>
    %cst_36 = arith.constant dense<0.000000e+00> : vector<16xf32>
    %118 = vector.multi_reduction <add>, %117, %cst_36 [1] : vector<16x16xf32> to vector<16xf32>
    %119 = vector.shape_cast %118 : vector<16xf32> to vector<16x1xf32>
    %120 = tpu.reciprocal %119 {approx = true} : vector<16x1xf32> -> vector<16x1xf32>
    %121 = vector.broadcast %120 : vector<16x1xf32> to vector<16x16xf32>
    %122 = arith.mulf %117, %121 : vector<16x16xf32>
    %123 = arith.truncf %122 : vector<16x16xf32> to vector<16x16xbf16>
    %cst_37 = arith.constant dense<0.000000e+00> : vector<16x8xf32>
    %124 = tpu.matmul %123, %109, %cst_37 {dimension_numbers = #tpu.dot_dimension_numbers<[1], [0], [0], [1], [0, 0, 1, 1], [], []>} : vector<16x16xbf16>, vector<16x8xbf16>, vector<16x8xf32> -> vector<16x8xf32>
    %125 = arith.truncf %124 : vector<16x8xf32> to vector<16x8xbf16>
    %126 = vector.extract_strided_slice %4 {offsets = [24, 0], sizes = [8, 32], strides = [1, 1]} : vector<32x32xbf16> to vector<8x32xbf16>
    %cst_38 = arith.constant dense<0.000000e+00> : vector<16x32xf32>
    %127 = tpu.matmul %125, %126, %cst_38 {dimension_numbers = #tpu.dot_dimension_numbers<[1], [0], [0], [1], [0, 0, 1, 1], [], []>} : vector<16x8xbf16>, vector<8x32xbf16>, vector<16x32xf32> -> vector<16x32xf32>
    %128 = arith.addf %103, %127 : vector<16x32xf32>
    %129 = arith.addf %1, %128 : vector<16x32xf32>
    %130 = vector.extract_strided_slice %3 {offsets = [0, 0], sizes = [1, 32], strides = [1, 1]} : vector<2x32xf32> to vector<1x32xf32>
    %131 = vector.extract_strided_slice %3 {offsets = [1, 0], sizes = [1, 32], strides = [1, 1]} : vector<2x32xf32> to vector<1x32xf32>
    %cst_39 = arith.constant dense<0.000000e+00> : vector<16xf32>
    %132 = vector.multi_reduction <add>, %129, %cst_39 [1] : vector<16x32xf32> to vector<16xf32>
    %133 = vector.shape_cast %132 : vector<16xf32> to vector<16x1xf32>
    %cst_40 = arith.constant 3.200000e+01 : f32
    %134 = vector.broadcast %cst_40 : f32 to vector<16x1xf32>
    %135 = arith.divf %133, %134 : vector<16x1xf32>
    %136 = vector.broadcast %135 : vector<16x1xf32> to vector<16x32xf32>
    %137 = arith.subf %129, %136 : vector<16x32xf32>
    %138 = arith.mulf %137, %137 : vector<16x32xf32>
    %cst_41 = arith.constant dense<0.000000e+00> : vector<16xf32>
    %139 = vector.multi_reduction <add>, %138, %cst_41 [1] : vector<16x32xf32> to vector<16xf32>
    %140 = vector.shape_cast %139 : vector<16xf32> to vector<16x1xf32>
    %cst_42 = arith.constant 3.200000e+01 : f32
    %141 = vector.broadcast %cst_42 : f32 to vector<16x1xf32>
    %142 = arith.divf %140, %141 : vector<16x1xf32>
    %cst_43 = arith.constant 9.99999974E-6 : f32
    %143 = vector.broadcast %cst_43 : f32 to vector<16x1xf32>
    %144 = arith.addf %142, %143 : vector<16x1xf32>
    %145 = math.rsqrt %144 : vector<16x1xf32>
    %146 = vector.broadcast %145 : vector<16x1xf32> to vector<16x32xf32>
    %147 = arith.mulf %137, %146 : vector<16x32xf32>
    %148 = vector.broadcast %130 : vector<1x32xf32> to vector<16x32xf32>
    %149 = arith.mulf %147, %148 : vector<16x32xf32>
    %150 = vector.broadcast %131 : vector<1x32xf32> to vector<16x32xf32>
    %151 = arith.addf %149, %150 : vector<16x32xf32>
    %152 = arith.truncf %151 : vector<16x32xf32> to vector<16x32xbf16>
    %c0_44 = arith.constant 0 : index
    %c0_45 = arith.constant 0 : index
    %153 = vector.load %arg6[%c0_44, %c0_45] : memref<32x128xbf16, #tpu.memory_space<vmem>>, vector<32x128xbf16>
    %cst_46 = arith.constant dense<0.000000e+00> : vector<16x128xf32>
    %154 = tpu.matmul %152, %153, %cst_46 {dimension_numbers = #tpu.dot_dimension_numbers<[1], [0], [0], [1], [0, 0, 1, 1], [], []>} : vector<16x32xbf16>, vector<32x128xbf16>, vector<16x128xf32> -> vector<16x128xf32>
    %c0_47 = arith.constant 0 : index
    %c0_48 = arith.constant 0 : index
    %155 = vector.load %arg7[%c0_47, %c0_48] : memref<1x128xf32, #tpu.memory_space<vmem>>, vector<1x128xf32>
    %156 = vector.broadcast %155 : vector<1x128xf32> to vector<16x128xf32>
    %157 = arith.addf %154, %156 : vector<16x128xf32>
    %cst_49 = arith.constant 5.000000e-01 : f32
    %158 = vector.broadcast %cst_49 : f32 to vector<16x128xf32>
    %159 = arith.mulf %158, %157 : vector<16x128xf32>
    %cst_50 = arith.constant 0.707106769 : f32
    %160 = vector.broadcast %cst_50 : f32 to vector<16x128xf32>
    %161 = arith.mulf %157, %160 : vector<16x128xf32>
    %cst_51 = arith.constant 0.000000e+00 : f32
    %162 = vector.broadcast %cst_51 : f32 to vector<16x128xf32>
    %163 = arith.cmpf olt, %161, %162 : vector<16x128xf32>
    %cst_52 = arith.constant -1.000000e+00 : f32
    %cst_53 = arith.constant 1.000000e+00 : f32
    %164 = vector.broadcast %cst_52 : f32 to vector<16x128xf32>
    %165 = vector.broadcast %cst_53 : f32 to vector<16x128xf32>
    %166 = arith.select %163, %164, %165 : vector<16x128xi1>, vector<16x128xf32>
    %167 = math.absf %161 : vector<16x128xf32>
    %cst_54 = arith.constant 0.327591091 : f32
    %168 = vector.broadcast %cst_54 : f32 to vector<16x128xf32>
    %169 = arith.mulf %168, %167 : vector<16x128xf32>
    %cst_55 = arith.constant 1.000000e+00 : f32
    %170 = vector.broadcast %cst_55 : f32 to vector<16x128xf32>
    %171 = arith.addf %170, %169 : vector<16x128xf32>
    %172 = tpu.reciprocal %171 {approx = true} : vector<16x128xf32> -> vector<16x128xf32>
    %cst_56 = arith.constant 1.06140542 : f32
    %173 = vector.broadcast %cst_56 : f32 to vector<16x128xf32>
    %174 = arith.mulf %173, %172 : vector<16x128xf32>
    %cst_57 = arith.constant -1.45315206 : f32
    %175 = vector.broadcast %cst_57 : f32 to vector<16x128xf32>
    %176 = arith.addf %174, %175 : vector<16x128xf32>
    %177 = arith.mulf %176, %172 : vector<16x128xf32>
    %cst_58 = arith.constant 1.42141378 : f32
    %178 = vector.broadcast %cst_58 : f32 to vector<16x128xf32>
    %179 = arith.addf %177, %178 : vector<16x128xf32>
    %180 = arith.mulf %179, %172 : vector<16x128xf32>
    %cst_59 = arith.constant -0.284496725 : f32
    %181 = vector.broadcast %cst_59 : f32 to vector<16x128xf32>
    %182 = arith.addf %180, %181 : vector<16x128xf32>
    %183 = arith.mulf %182, %172 : vector<16x128xf32>
    %cst_60 = arith.constant 0.254829586 : f32
    %184 = vector.broadcast %cst_60 : f32 to vector<16x128xf32>
    %185 = arith.addf %183, %184 : vector<16x128xf32>
    %186 = arith.mulf %185, %172 : vector<16x128xf32>
    %cst_61 = arith.constant 0.000000e+00 : f32
    %187 = vector.broadcast %cst_61 : f32 to vector<16x128xf32>
    %188 = arith.subf %187, %167 : vector<16x128xf32>
    %189 = arith.mulf %188, %167 : vector<16x128xf32>
    %190 = math.exp %189 : vector<16x128xf32>
    %191 = arith.mulf %186, %190 : vector<16x128xf32>
    %cst_62 = arith.constant 1.000000e+00 : f32
    %192 = vector.broadcast %cst_62 : f32 to vector<16x128xf32>
    %193 = arith.subf %192, %191 : vector<16x128xf32>
    %194 = arith.mulf %166, %193 : vector<16x128xf32>
    %cst_63 = arith.constant 1.000000e+00 : f32
    %195 = vector.broadcast %cst_63 : f32 to vector<16x128xf32>
    %196 = arith.addf %195, %194 : vector<16x128xf32>
    %197 = arith.mulf %159, %196 : vector<16x128xf32>
    %198 = arith.truncf %197 : vector<16x128xf32> to vector<16x128xbf16>
    %c0_64 = arith.constant 0 : index
    %c0_65 = arith.constant 0 : index
    %199 = vector.load %arg8[%c0_64, %c0_65] : memref<128x32xbf16, #tpu.memory_space<vmem>>, vector<128x32xbf16>
    %cst_66 = arith.constant dense<0.000000e+00> : vector<16x32xf32>
    %200 = tpu.matmul %198, %199, %cst_66 {dimension_numbers = #tpu.dot_dimension_numbers<[1], [0], [0], [1], [0, 0, 1, 1], [], []>} : vector<16x128xbf16>, vector<128x32xbf16>, vector<16x32xf32> -> vector<16x32xf32>
    %c0_67 = arith.constant 0 : index
    %c0_68 = arith.constant 0 : index
    %201 = vector.load %arg9[%c0_67, %c0_68] : memref<1x32xf32, #tpu.memory_space<vmem>>, vector<1x32xf32>
    %202 = vector.broadcast %201 : vector<1x32xf32> to vector<16x32xf32>
    %203 = arith.addf %200, %202 : vector<16x32xf32>
    %204 = arith.addf %129, %203 : vector<16x32xf32>
    %c0_69 = arith.constant 0 : index
    %c0_70 = arith.constant 0 : index
    %c0_71 = arith.constant 0 : index
    %205 = vector.load %arg10[%c0_69, %c0_70, %c0_71] : memref<1x16x32xf32, #tpu.memory_space<vmem>>, vector<1x16x32xf32>
    %206 = vector.shape_cast %205 : vector<1x16x32xf32> to vector<16x32xf32>
    %207 = vector.shape_cast %204 : vector<16x32xf32> to vector<1x16x32xf32>
    tpu.vector_store %arg10[%c0_69, %c0_70, %c0_71], %207 {strides = array<i32>} : memref<1x16x32xf32, #tpu.memory_space<vmem>>, vector<1x16x32xf32>,
    return
  }
  func.func @transform_0(%arg0: i32) -> (i32, i32, i32) {
    %c0_i32 = arith.constant 0 : i32
    %c0_i32_0 = arith.constant 0 : i32
    %c0_i32_1 = arith.constant 0 : i32
    return %arg0, %c0_i32, %c0_i32_0 : i32, i32, i32
  }
  func.func @transform_1(%arg0: i32) -> (i32, i32) {
    %c0_i32 = arith.constant 0 : i32
    %c0_i32_0 = arith.constant 0 : i32
    %c0_i32_1 = arith.constant 0 : i32
    return %c0_i32, %c0_i32_0 : i32, i32
  }
  func.func @transform_2(%arg0: i32) -> (i32, i32) {
    %c0_i32 = arith.constant 0 : i32
    %c0_i32_0 = arith.constant 0 : i32
    %c0_i32_1 = arith.constant 0 : i32
    return %c0_i32, %c0_i32_0 : i32, i32
  }
  func.func @transform_3(%arg0: i32) -> (i32, i32) {
    %c0_i32 = arith.constant 0 : i32
    %c0_i32_0 = arith.constant 0 : i32
    %c0_i32_1 = arith.constant 0 : i32
    return %c0_i32, %c0_i32_0 : i32, i32
  }
  func.func @transform_4(%arg0: i32) -> (i32, i32) {
    %c0_i32 = arith.constant 0 : i32
    %c0_i32_0 = arith.constant 0 : i32
    %c0_i32_1 = arith.constant 0 : i32
    return %c0_i32, %c0_i32_0 : i32, i32
  }
  func.func @transform_5(%arg0: i32) -> (i32, i32) {
    %c0_i32 = arith.constant 0 : i32
    %c0_i32_0 = arith.constant 0 : i32
    %c0_i32_1 = arith.constant 0 : i32
    return %c0_i32, %c0_i32_0 : i32, i32
  }
  func.func @transform_6(%arg0: i32) -> (i32, i32) {
    %c0_i32 = arith.constant 0 : i32
    %c0_i32_0 = arith.constant 0 : i32
    %c0_i32_1 = arith.constant 0 : i32
    return %c0_i32, %c0_i32_0 : i32, i32
  }
  func.func @transform_7(%arg0: i32) -> (i32, i32) {
    %c0_i32 = arith.constant 0 : i32
    %c0_i32_0 = arith.constant 0 : i32
    %c0_i32_1 = arith.constant 0 : i32
    return %c0_i32, %c0_i32_0 : i32, i32
  }
  func.func @transform_8(%arg0: i32) -> (i32, i32) {
    %c0_i32 = arith.constant 0 : i32
    %c0_i32_0 = arith.constant 0 : i32
    %c0_i32_1 = arith.constant 0 : i32
    return %c0_i32, %c0_i32_0 : i32, i32
  }
  func.func @transform_9(%arg0: i32) -> (i32, i32, i32) {
    %c0_i32 = arith.constant 0 : i32
    %c0_i32_0 = arith.constant 0 : i32
    %c0_i32_1 = arith.constant 0 : i32
    return %arg0, %c0_i32, %c0_i32_0 : i32, i32, i32
  }
}

module attributes {stable_mosaic.version = 11 : i64} {
  func.func @_head_kernel(%arg0: memref<2x32xf32, #tpu.memory_space<vmem>>, %arg1: memref<32x32xbf16, #tpu.memory_space<vmem>>, %arg2: memref<1x32xf32, #tpu.memory_space<vmem>>, %arg3: memref<32x64xbf16, #tpu.memory_space<vmem>>, %arg4: memref<1x64xf32, #tpu.memory_space<vmem>>, %arg5: memref<64x32xbf16, #tpu.memory_space<vmem>>, %arg6: memref<1x32xf32, #tpu.memory_space<vmem>>, %arg7: memref<32x5xbf16, #tpu.memory_space<vmem>>, %arg8: memref<1x5xf32, #tpu.memory_space<vmem>>, %arg9: memref<2x5xf32, #tpu.memory_space<vmem>>) attributes {dimension_semantics = [], scalar_prefetch = 0 : i64, scratch_operands = 0 : i64, tpu.core_type = #tpu.core_type<tc>} {
    %c0 = arith.constant 0 : index
    %c0_0 = arith.constant 0 : index
    %0 = vector.load %arg0[%c0, %c0_0] : memref<2x32xf32, #tpu.memory_space<vmem>>, vector<2x32xf32>
    %c0_1 = arith.constant 0 : index
    %c0_2 = arith.constant 0 : index
    %1 = vector.load %arg1[%c0_1, %c0_2] : memref<32x32xbf16, #tpu.memory_space<vmem>>, vector<32x32xbf16>
    %c0_3 = arith.constant 0 : index
    %c0_4 = arith.constant 0 : index
    %2 = vector.load %arg2[%c0_3, %c0_4] : memref<1x32xf32, #tpu.memory_space<vmem>>, vector<1x32xf32>
    %3 = arith.truncf %0 : vector<2x32xf32> to vector<2x32xbf16>
    %cst = arith.constant dense<0.000000e+00> : vector<2x32xf32>
    %4 = tpu.matmul %3, %1, %cst {dimension_numbers = #tpu.dot_dimension_numbers<[1], [0], [0], [1], [0, 0, 1, 1], [], []>} : vector<2x32xbf16>, vector<32x32xbf16>, vector<2x32xf32> -> vector<2x32xf32>
    %5 = vector.broadcast %2 : vector<1x32xf32> to vector<2x32xf32>
    %6 = arith.addf %4, %5 : vector<2x32xf32>
    %c0_5 = arith.constant 0 : index
    %c0_6 = arith.constant 0 : index
    %7 = vector.load %arg3[%c0_5, %c0_6] : memref<32x64xbf16, #tpu.memory_space<vmem>>, vector<32x64xbf16>
    %c0_7 = arith.constant 0 : index
    %c0_8 = arith.constant 0 : index
    %8 = vector.load %arg4[%c0_7, %c0_8] : memref<1x64xf32, #tpu.memory_space<vmem>>, vector<1x64xf32>
    %9 = arith.truncf %6 : vector<2x32xf32> to vector<2x32xbf16>
    %cst_9 = arith.constant dense<0.000000e+00> : vector<2x64xf32>
    %10 = tpu.matmul %9, %7, %cst_9 {dimension_numbers = #tpu.dot_dimension_numbers<[1], [0], [0], [1], [0, 0, 1, 1], [], []>} : vector<2x32xbf16>, vector<32x64xbf16>, vector<2x64xf32> -> vector<2x64xf32>
    %11 = vector.broadcast %8 : vector<1x64xf32> to vector<2x64xf32>
    %12 = arith.addf %10, %11 : vector<2x64xf32>
    %cst_10 = arith.constant 0.000000e+00 : f32
    %13 = vector.broadcast %cst_10 : f32 to vector<2x64xf32>
    %14 = arith.maximumf %12, %13 : vector<2x64xf32>
    %c0_11 = arith.constant 0 : index
    %c0_12 = arith.constant 0 : index
    %15 = vector.load %arg5[%c0_11, %c0_12] : memref<64x32xbf16, #tpu.memory_space<vmem>>, vector<64x32xbf16>
    %c0_13 = arith.constant 0 : index
    %c0_14 = arith.constant 0 : index
    %16 = vector.load %arg6[%c0_13, %c0_14] : memref<1x32xf32, #tpu.memory_space<vmem>>, vector<1x32xf32>
    %17 = arith.truncf %14 : vector<2x64xf32> to vector<2x64xbf16>
    %cst_15 = arith.constant dense<0.000000e+00> : vector<2x32xf32>
    %18 = tpu.matmul %17, %15, %cst_15 {dimension_numbers = #tpu.dot_dimension_numbers<[1], [0], [0], [1], [0, 0, 1, 1], [], []>} : vector<2x64xbf16>, vector<64x32xbf16>, vector<2x32xf32> -> vector<2x32xf32>
    %19 = vector.broadcast %16 : vector<1x32xf32> to vector<2x32xf32>
    %20 = arith.addf %18, %19 : vector<2x32xf32>
    %cst_16 = arith.constant 0.000000e+00 : f32
    %21 = vector.broadcast %cst_16 : f32 to vector<2x32xf32>
    %22 = arith.maximumf %20, %21 : vector<2x32xf32>
    %c0_17 = arith.constant 0 : index
    %c0_18 = arith.constant 0 : index
    %23 = vector.load %arg7[%c0_17, %c0_18] : memref<32x5xbf16, #tpu.memory_space<vmem>>, vector<32x5xbf16>
    %c0_19 = arith.constant 0 : index
    %c0_20 = arith.constant 0 : index
    %24 = vector.load %arg8[%c0_19, %c0_20] : memref<1x5xf32, #tpu.memory_space<vmem>>, vector<1x5xf32>
    %25 = arith.truncf %22 : vector<2x32xf32> to vector<2x32xbf16>
    %cst_21 = arith.constant dense<0.000000e+00> : vector<2x5xf32>
    %26 = tpu.matmul %25, %23, %cst_21 {dimension_numbers = #tpu.dot_dimension_numbers<[1], [0], [0], [1], [0, 0, 1, 1], [], []>} : vector<2x32xbf16>, vector<32x5xbf16>, vector<2x5xf32> -> vector<2x5xf32>
    %27 = vector.broadcast %24 : vector<1x5xf32> to vector<2x5xf32>
    %28 = arith.addf %26, %27 : vector<2x5xf32>
    %c0_22 = arith.constant 0 : index
    %c0_23 = arith.constant 0 : index
    %29 = vector.load %arg9[%c0_22, %c0_23] : memref<2x5xf32, #tpu.memory_space<vmem>>, vector<2x5xf32>
    tpu.vector_store %arg9[%c0_22, %c0_23], %28 {strides = array<i32>} : memref<2x5xf32, #tpu.memory_space<vmem>>, vector<2x5xf32>,
    return
  }
}

</mosaic_0001>

<bundles_post_ra>
// kernel: conv_transformer_forward.7
= control target key start
LH: loop header
LB: loop body
LE: loop exit
PB: predicated region body
PF: predicated region fallthrough
CT: control target
= control target key end

     0   :  { %v444_v1 = vmov 0.0   ;;  %vm445_vm0 = vmmov 0   ;;  %vm59_vm1 = vcmask 261120   ;;  %s561_s0 = inlined_call_operand.vmem [shape: f32[2,32], index: 0, kind: input, shape index: {}]   ;;  %s562_s1 = inlined_call_operand.vmem [shape: bf16[32,32], index: 1, kind: input, shape index: {}]   ;;  %s563_s2 = inlined_call_operand.vmem [shape: f32[1,32], index: 2, kind: input, shape index: {}]   ;;  %s564_s3 = inlined_call_operand.vmem [shape: bf16[32,64], index: 3, kind: input, shape index: {}]   ;;  %s565_s4 = inlined_call_operand.vmem [shape: f32[1,64], index: 4, kind: input, shape index: {}]   ;;  %s566_s5 = inlined_call_operand.vmem [shape: bf16[64,32], index: 5, kind: input, shape index: {}]   ;;  %s567_s6 = inlined_call_operand.vmem [shape: f32[1,32], index: 6, kind: input, shape index: {}]   ;;  %s568_s7 = inlined_call_operand.vmem [shape: bf16[32,5], index: 7, kind: input, shape index: {}]   ;;  %s569_s8 = inlined_call_operand.vmem [shape: f32[1,5], index: 8, kind: input, shape index: {}]   ;;  %s570_s9 = inlined_call_operand.hbm [shape: f32[2,5], index: 9, kind: output, shape index: {}]  }
   0x1   :  { %v410_v0 = vld [vmem:[%s562_s1] sm:$0xff]   ;;  %371 = vmatprep.subr.bf16.mxu0 %v444_v1  ;;  %v411_v2 = vld [vmem:[%s562_s1 + $0x8] sm:$0xff]   ;;  %379 = vmatprep.subr.bf16.mxu1 %v444_v1 }
   0x2   :  { %372 = vmatpush3.bf16.msra.mxu0 %v410_v0  ;;  %375 = vmatprep.mubr.msk.bf16.mxu0 %vm445_vm0, %v444_v1  ;;  %v34_v3 = vld [vmem:[%s561_s0] sm:$0x3] }
   0x3   :  { %v412_v4 = vld [vmem:[%s564_s3] sm:$0xff]   ;;  %373 = vmatprep.subr.bf16.mxu0 %v444_v1  ;;  %383 = vmatprep.mubr.msk.bf16.mxu1 %vm445_vm0, %v444_v1  ;;  %v40_v5 = vpack.c.bf16 %v34_v3, %v34_v3 }
   0x4   :  { %380 = vmatpush3.bf16.msra.mxu1 %v412_v4 }
   0x5   :  { %381 = vmatprep.subr.bf16.mxu1 %v444_v1 }
   0x6   :  { %374 = vmatpush3.bf16.msra.mxu0 %v411_v2 }
   0x7   :  { %387 = vmatprep.subr.bf16.mxu0 %v444_v1 }
   0x8   :  { %14 = vsyncpa [#allocation3], 0  ;;  %v413_v6 = vld [vmem:[%s564_s3 + $0x8] sm:$0xff]   ;;  %v414_v7 = vld [vmem:[%s566_s5] sm:$0xff]   ;;  %vm211_vm2 = vcmask 523264   ;;  %s446_s12 = smov [#allocation2]  }
   0x9   :  { %376 = vmatmul.mubr.msk.bf16.vlgmr.msra.gmra.mrb[0].mxu0 %vm59_vm1, %v40_v5  ;;  %382 = vmatpush3.bf16.msra.mxu1 %v413_v6  ;;  %v415_v8 = vld [vmem:[%s566_s5 + $0x8] sm:$0xff]   ;;  %v339_v9 = vld [vmem:[%s563_s2] ss:$0 sm:$0xff]  ;;  %v416_v16 = vld [vmem:[%s566_s5 + $0x10] sm:$0xff]   ;;  %vm323_vm3 = vcmask 33792  }
   0xa   :  { %395 = vmatprep.mubr.msk.bf16.mxu0 %vm445_vm0, %v444_v1  ;;  %399 = vmatprep.subr.bf16.mxu1 %v444_v1  ;;  %v417_v17 = vld [vmem:[%s566_s5 + $0x18] sm:$0xff]   ;;  %v418_v18 = vld [vmem:[%s568_s7] sm:$0xff]   ;;  %v419_v27 = vld [vmem:[%s568_s7 + $0x8] sm:$0xff]   ;;  %s331_s7 = sshll.u32 %s446_s12, 4  ;;  %s332_s7 = int_to_ptr.vmem [resolvable:$true] %s331_s7 }
   0xb   :  { %388 = vmatpush3.bf16.msra.mxu0 %v414_v7  ;;  %v343_v19 = vld [vmem:[%s565_s4] ss:$0 sm:$0xff]  ;;  %p425_p1 = scmp.lt.s32.totalorder %s332_s7, %s332_s7 }
   0xc   :  { %389 = vmatprep.subr.bf16.mxu0 %v444_v1  ;;  %v347_v28 = vld [vmem:[%s567_s6] ss:$0 sm:$0xff]  ;;  %s420_s6 = scalar_lea.vmem %s332_s7, 32 }
   0xd   :  { %v353_v36 = vld [vmem:[%s569_s8] ss:$0 sm:$0xff]  ;;  %p421_p0 = scmp.ne.s32.totalorder %s332_s7, %s420_s6  ;;  %p426_p2 = scmp.lt.s32.totalorder %s420_s6, %s420_s6 }
   0xf   :  { %390 = vmatpush3.bf16.msra.mxu0 %v415_v8  ;;  %p427_p3 = por %p426_p2, %p425_p1 }
  0x10   :  { %391 = vmatprep.subr.bf16.mxu0 %v444_v1 }
  0x11   :  { %p428_p4 = pnand %p427_p3, %p421_p0 }
  0x13   :  { %392 = vmatpush3.bf16.msra.mxu0 %v416_v16 }
  0x14   :  { %393 = vmatprep.subr.bf16.mxu0 %v444_v1 }
  0x17   :  { %394 = vmatpush3.bf16.msra.mxu0 %v417_v17 }
  0xdc   :  { %v97_v10 = vpop.f32.mrb[0].mxu0 }
  0xdd   :  { %v98_v11 = vadd.f32 %v339_v9, %v97_v10  ;;  %v377_v12 = vpop.f32.mrb[1].mxu0 }
  0xde   :  { %v100_v13 = vpop.f32.mrb[2].mxu0 }
  0xdf   :  { %v108_v14 = vpack.c.bf16 %v98_v11, %v98_v11  ;;  %v378_v15 = vpop.f32.mrb[3].mxu0 }
  0xe1   :  { %384 = vmatmul.mubr.msk.bf16.vlgmr.msra.gmra.mrb[0].mxu1 %vm59_vm1, %v108_v14 }
  0xe2   :  { %403 = vmatprep.mubr.msk.bf16.mxu1 %vm445_vm0, %v444_v1  ;;  %400 = vmatpush3.bf16.msra.mxu1 %v418_v18 }
  0xe3   :  { %401 = vmatprep.subr.bf16.mxu1 %v444_v1 }
  0xe6   :  { %402 = vmatpush3.bf16.msra.mxu1 %v419_v27 }
 0x1b4   :  { %v164_v20 = vpop.f32.mrb[0].mxu1 }
 0x1b5   :  { %v165_v21 = vadd.f32 %v343_v19, %v164_v20  ;;  %v385_v22 = vpop.f32.mrb[1].mxu1 }
 0x1b6   :  { %v167_v23 = vpop.f32.mrb[2].mxu1 }
 0x1b7   :  { %v170_v24 = vmax.f32 %v165_v21, 0.0  ;;  %v386_v25 = vpop.f32.mrb[3].mxu1 }
 0x1b9   :  { %v180_v26 = vpack.c.bf16 %v170_v24, %v170_v24 }
 0x1bb   :  { %396 = vmatmul.mubr.msk.bf16.vlgmr.msra.gmra.mrb[4].mxu0 %vm211_vm2, %v180_v26 }
 0x28e   :  { %v249_v29 = vpop.f32.mrb[4].mxu0 }
 0x28f   :  { %v250_v30 = vadd.f32 %v347_v28, %v249_v29  ;;  %v397_v31 = vpop.f32.mrb[5].mxu0 }
 0x290   :  { %v252_v32 = vpop.f32.mrb[6].mxu0 }
 0x291   :  { %v255_v33 = vmax.f32 %v250_v30, 0.0  ;;  %v398_v34 = vpop.f32.mrb[7].mxu0 }
 0x293   :  { %v261_v35 = vpack.c.bf16 %v255_v33, %v255_v33 }
 0x295   :  { %404 = vmatmul.mubr.msk.bf16.vlgmr.msra.gmra.mrb[4].mxu1 %vm59_vm1, %v261_v35 }
 0x368   :  { %v317_v37 = vpop.f32.mrb[4].mxu1 }
 0x369   :  { %v318_v38 = vadd.f32 %v353_v36, %v317_v37  ;;  %v405_v39 = vpop.f32.mrb[5].mxu1 }
 0x36a   :  { %v320_v40 = vpop.f32.mrb[6].mxu1 }
 0x36b   :  { %v406_v41 = vpop.f32.mrb[7].mxu1  ;;  %324 = vst.msk [vmem:[#allocation2] sm:$0x3] %vm323_vm3, %v318_v38 }
 0x36c   :  { %431 = shalt.err (!%p428_p4)
}
 0x36d   :  { %s432_s8 = scalar_lea.hbm %s570_s9, 32 }
 0x36e   :  { %p433_p5 = scmp.ne.s32.totalorder %s570_s9, %s432_s8  ;;  %p436_p6 = scmp.lt.u32.totalorder %s432_s8, %s570_s9 }
 0x370   :  { %p438_p7 = pnand %p436_p6, %p433_p5 }
 0x372   :  { %441 = shalt.err (!%p438_p7)
}
 0x373   :  { %334 = dma.vmem_to_hbm [thread:$0]  %s332_s7, 32, %s570_s9, [#allocation3]  }
 0x374   :  { %442 = dma.done.wait [#allocation3], 32  }
 0x375   :  { %443 = vsyncadd [#allocation3], 4294967264 }
 0x376   :  { %338 = vsyncpa [#allocation3], 1 }

// kernel: conv_transformer_forward.4
= control target key start
LH: loop header
LB: loop body
LE: loop exit
PB: predicated region body
PF: predicated region fallthrough
CT: control target
= control target key end

     0   :  { %s1780_s24 = smov 0   ;;  %s2023_s0 = inlined_call_operand.vmem [shape: f32[2,32,10], index: 0, kind: input, shape index: {}]   ;;  %s2024_s1 = inlined_call_operand.vmem [shape: bf16[10,16], index: 1, kind: input, shape index: {}]   ;;  %s2025_s2 = inlined_call_operand.vmem [shape: bf16[3,16,32], index: 2, kind: input, shape index: {}]   ;;  %s2026_s3 = inlined_call_operand.vmem [shape: bf16[3,32,32], index: 3, kind: input, shape index: {}]   ;;  %s2027_s4 = inlined_call_operand.vmem [shape: f32[2,16], index: 4, kind: input, shape index: {}]   ;;  %s2028_s5 = inlined_call_operand.vmem [shape: f32[2,32], index: 5, kind: input, shape index: {}]   ;;  %s2029_s6 = inlined_call_operand.vmem [shape: f32[2,32], index: 6, kind: input, shape index: {}]   ;;  %s2030_s7 = inlined_call_operand.vmem [shape: f32[2,16,32], index: 7, kind: output, shape index: {}]  }
   0x1 LB: > { %s1470_s25 = sadd.s32 4294967295, %s1735_s24   ;;  %p1474_p0 = scmp.ge.s32.totalorder %s1735_s24, 1  ;;  %s1735_s24 = sphi %s1780_s24, %s17_s24  }
   0x2   : > { %p237_p1 = scmp.lt.s32.totalorder %s1735_s24, 3 }
   0x4   : > { %p238_p2 = pnand %p1474_p0, %p237_p1 }
   0x5   : > { %v1679_v0 = vld [vmem:[%s2024_s1] sm:$0x1f] (!%p238_p2)   ;;  %vm303_vm0 = vcmask (!%p238_p2), 1044480   ;;  %p269_p3 = scmp.lt.s32.totalorder (!%p238_p2), %s1470_s25, 1  ;;  %vm296_vm1 = vcmask (!%p238_p2), 80896   ;;  %v460_v8 = vlaneseq (!%p238_p2)  ;;  %v1737_v14 = vmov (!%p238_p2), 0.0  }
   0x6   : > { %241 = sbr.rel (%p238_p2) target bundleno = 1335 (0x537), region = 48  ;;  %1667 = vmatprep.subr.msk.bf16.mxu0 (!%p238_p2), %vm303_vm0, %v1679_v0  ;;  %v305_v1 = vsel (!%p238_p2), %vm303_vm0, %v1679_v0, 0  ;;  %vm505_vm4 = vcmask (!%p238_p2), 261120  }
   0x7   : > { %1556 = vmatpush3.bf16.msra.mxu0 (!%p238_p2), %v305_v1  ;;  %v1797_v9 = vshrl.u32 (!%p238_p2), %v460_v8, 7  ;;  %v1799_v10 = vand.u32 (!%p238_p2), 127, %v460_v8 }
   0x9   : > { %v1802_v11 = vadd.s32 (!%p238_p2), 8, %v1797_v9  ;;  %v491_v12 = vadd.s32 (!%p238_p2), 4294967295, %v1797_v9  ;;  %vm563_vm11 = vcmp.eq.s32.totalorder (!%p238_p2), %v1799_v10, %v1797_v9 }
   0xb   : > { %v492_v13 = vadd.s32 (!%p238_p2), 4294967295, %v1802_v11  ;;  %vm495_vm2 = vcmp.eq.s32.totalorder (!%p238_p2), %v1799_v10, %v491_v12  ;;  %vm564_vm12 = vcmp.eq.s32.totalorder (!%p238_p2), %v1799_v10, %v1802_v11 }
   0xc   : > { %v499_v15 = vsel (!%p238_p2), %vm495_vm2, 1.0, %v1737_v14 }
   0xd   : > { %s2032_s25 = smov (!%p269_p3, %s1470_s25), 1  ;;  %vm496_vm3 = vcmp.eq.s32.totalorder %v1799_v10, %v492_v13 }
   0xe   : > { %s1511_s28 = sshll.u32 %s2032_s25, 5  ;;  %v500_v16 = vsel %vm496_vm3, 1.0, %v1737_v14  ;;  %vm636_vm3 = vcmask 130048   ;;  %s1512_s12 = sshll.u32 %s2032_s25, 4 }
   0xf   : > { %s273_s8 = scalar_lea.vmem %s2023_s0, %s1511_s28  ;;  %v503_v17 = vpack.c.bf16 %v500_v16, %v499_v15  ;;  %s278_s15 = scalar_lea.vmem %s2030_s7, %s1512_s12 }
  0x10   : > { %v283_v2 = vld [vmem:[%s273_s8] sm:$0xff]  ;;  %v284_v3 = vld [vmem:[%s273_s8 + $0x8] sm:$0xff]  ;;  %v285_v4 = vld [vmem:[%s273_s8 + $0x10] sm:$0xff] }
  0x11   : > { %v287_v5 = vpack.c.bf16 %v284_v3, %v283_v2  ;;  %v286_v6 = vld [vmem:[%s273_s8 + $0x18] sm:$0xff] }
  0x12   : > { %v288_v7 = vpack.c.bf16 %v286_v6, %v285_v4 }
  0x13   : > { %1557 = vmatprep.mubr.msk.bf16.mxu0 %vm296_vm1, %v287_v5 }
  0x14   : > { %1558 = vmatmul.mubr.msk.bf16.vlgmr.msra.gmra.mrb[0].mxu0 %vm296_vm1, %v288_v7 }
  0x15   : > { %1565 = vmatprep.mubr.msk.bf16.mxu0 %vm505_vm4, %v503_v17 }
  0xe7   : > { %v1811_v18 = vpop.f32.mrb[0].mxu0 }
  0xe8   : > { %v1814_v19 = vmul.f32 0.70710677, %v1811_v18  ;;  %v1816_v20 = vpop.f32.mrb[1].mxu0 }
  0xe9   : > { %v1819_v21 = vmul.f32 0.70710677, %v1816_v20  ;;  %v1821_v22 = vpop.f32.mrb[2].mxu0 }
  0xea   : > { %v374_v23 = vand.u32 2147483647, %v1814_v19  ;;  %v1825_v24 = vmul.f32 0.70710677, %v1821_v22  ;;  %v1828_v26 = vpop.f32.mrb[3].mxu0  ;;  %vm366_vm5 = vcmp.lt.f32.partialorder %v1814_v19, 0.0 }
  0xeb   : > { %v372_v25 = vand.u32 2147483647, %v1819_v21  ;;  %v1832_v31 = vmul.f32 0.70710677, %v1828_v26  ;;  %vm364_vm6 = vcmp.lt.f32.partialorder %v1819_v21, 0.0 }
  0xec   : > { %v378_v27 = vmul.f32 0.3275911, %v374_v23  ;;  %v375_v29 = vand.u32 2147483647, %v1825_v24  ;;  %v426_v38 = vsub.f32 0.0, %v374_v23  ;;  %vm367_vm7 = vcmp.lt.f32.partialorder %v1825_v24, 0.0 }
  0xed   : > { %v376_v28 = vmul.f32 0.3275911, %v372_v25  ;;  %v373_v34 = vand.u32 2147483647, %v1832_v31  ;;  %v424_v39 = vsub.f32 0.0, %v372_v25  ;;  %vm365_vm8 = vcmp.lt.f32.partialorder %v1832_v31, 0.0 }
  0xee   : > { %v382_v30 = vadd.f32 1.0, %v378_v27  ;;  %v379_v33 = vmul.f32 0.3275911, %v375_v29  ;;  %v430_v41 = vmul.f32 %v426_v38, %v374_v23  ;;  %v427_v42 = vsub.f32 0.0, %v375_v29  ;;  %v280_v21 = vld [vmem:[%s2027_s4] sm:$0x3] }
  0xef   : > { %v380_v32 = vadd.f32 1.0, %v376_v28  ;;  %v377_v36 = vmul.f32 0.3275911, %v373_v34  ;;  %v428_v45 = vmul.f32 %v424_v39, %v372_v25  ;;  %v425_v47 = vsub.f32 0.0, %v373_v34 }
  0xf0   : > { %1689 = vrcp.f32 %v382_v30  ;;  %v383_v35 = vadd.f32 1.0, %v379_v33  ;;  %v436_v50 = vmul.f32 1.442695, %v430_v41  ;;  %v431_v52 = vmul.f32 %v427_v42, %v375_v29 }
  0xf1   : > { %1691 = vrcp.f32 %v380_v32  ;;  %v381_v37 = vadd.f32 1.0, %v377_v36  ;;  %v432_v54 = vmul.f32 1.442695, %v428_v45  ;;  %v429_v58 = vmul.f32 %v425_v47, %v373_v34 }
  0xf2   : > { %1693 = vrcp.f32 %v383_v35  ;;  %v438_v63 = vmul.f32 1.442695, %v431_v52  ;;  %v1738_v45 = vmov 1.0  }
  0xf3   : > { %1695 = vrcp.f32 %v381_v37  ;;  %v434_v4 = vmul.f32 1.442695, %v429_v58  ;;  %v368_v19 = vsel %vm364_vm6, -1.0, %v1738_v45  ;;  %v1850_v58 = vsub.s32 1, %v1797_v9 }
  0xf4   : > { %1697 = vpow2.f32 %v436_v50 }
  0xf5   : > { %1699 = vpow2.f32 %v432_v54 }
  0xf6   : > { %1701 = vpow2.f32 %v438_v63 }
  0xf7   : > { %1703 = vpow2.f32 %v434_v4  ;;  %v488_v4 = vadd.s32 24, %v1797_v9 }
  0xf9   : > { %vm566_vm14 = vcmp.eq.s32.totalorder %v1799_v10, %v488_v4 }
  0xfa   : > { %v1690_v40 = vpop.eup %1689 }
  0xfb   : > { %v1692_v43 = vpop.eup %1691  ;;  %v390_v44 = vmul.f32 1.0614054, %v1690_v40 }
  0xfc   : > { %v388_v46 = vmul.f32 1.0614054, %v1692_v43  ;;  %v1694_v49 = vpop.eup %1693 }
  0xfd   : > { %v394_v48 = vadd.f32 -1.4531521, %v390_v44  ;;  %v391_v55 = vmul.f32 1.0614054, %v1694_v49  ;;  %v1696_v56 = vpop.eup %1695 }
  0xfe   : > { %v392_v51 = vadd.f32 -1.4531521, %v388_v46  ;;  %v389_v61 = vmul.f32 1.0614054, %v1696_v56  ;;  %v1698_v32 = vpop.eup %1697  ;;  %v1839_v46 = vsub.s32 0, %v1797_v9 }
  0xff   : > { %v398_v53 = vmul.f32 %v1690_v40, %v394_v48  ;;  %v395_v60 = vadd.f32 -1.4531521, %v391_v55  ;;  %v1700_v34 = vpop.eup %1699 }
 0x100   : > { %v396_v57 = vmul.f32 %v1692_v43, %v392_v51  ;;  %v393_v2 = vadd.f32 -1.4531521, %v389_v61  ;;  %v1702_v44 = vpop.eup %1701  ;;  %v358_v51 = vmul.f32 0.5, %v1811_v18  ;;  %v369_v18 = vsel %vm365_vm8, -1.0, %v1738_v45 }
 0x101   : > { %v402_v59 = vadd.f32 1.4214138, %v398_v53  ;;  %v399_v1 = vmul.f32 %v1694_v49, %v395_v60  ;;  %v1704_v50 = vpop.eup %1703  ;;  %v371_v60 = vsel %vm367_vm7, -1.0, %v1738_v45 }
 0x102   : > { %v400_v62 = vadd.f32 1.4214138, %v396_v57  ;;  %v397_v7 = vmul.f32 %v1696_v56, %v393_v2  ;;  %v463_v57 = vrot.slane %v280_v21, %v1839_v46  ;;  %v471_v2 = vrot.slane %v280_v21, %v1850_v58 }
 0x103   : > { %v406_v0 = vmul.f32 %v1690_v40, %v402_v59  ;;  %v403_v6 = vadd.f32 1.4214138, %v399_v1 }
 0x104   : > { %v404_v3 = vmul.f32 %v1692_v43, %v400_v62  ;;  %v401_v15 = vadd.f32 1.4214138, %v397_v7  ;;  %v357_v7 = vmul.f32 0.5, %v1828_v26 }
 0x105   : > { %v410_v5 = vadd.f32 -0.28449672, %v406_v0  ;;  %v407_v13 = vmul.f32 %v1694_v49, %v403_v6  ;;  %v359_v0 = vmul.f32 0.5, %v1821_v22 }
 0x106   : > { %v408_v8 = vadd.f32 -0.28449672, %v404_v3  ;;  %v405_v25 = vmul.f32 %v1696_v56, %v401_v15  ;;  %v487_v3 = vadd.s32 16, %v1797_v9 }
 0x107   : > { %v414_v12 = vmul.f32 %v1690_v40, %v410_v5  ;;  %v411_v23 = vadd.f32 -0.28449672, %v407_v13 }
 0x108   : > { %v412_v16 = vmul.f32 %v1692_v43, %v408_v8  ;;  %v409_v30 = vadd.f32 -0.28449672, %v405_v25  ;;  %v493_v15 = vadd.s32 4294967295, %v487_v3  ;;  %vm565_vm13 = vcmp.eq.s32.totalorder %v1799_v10, %v487_v3 }
 0x109   : > { %v418_v17 = vadd.f32 0.2548296, %v414_v12  ;;  %v415_v29 = vmul.f32 %v1694_v49, %v411_v23  ;;  %v494_v23 = vadd.s32 4294967295, %v488_v4 }
 0x10a   : > { %v416_v27 = vadd.f32 0.2548296, %v412_v16  ;;  %v413_v37 = vmul.f32 %v1696_v56, %v409_v30  ;;  %vm497_vm9 = vcmp.eq.s32.totalorder %v1799_v10, %v493_v15 }
 0x10b   : > { %v422_v28 = vmul.f32 %v1690_v40, %v418_v17  ;;  %v419_v36 = vadd.f32 0.2548296, %v415_v29  ;;  %v370_v40 = vsel %vm366_vm5, -1.0, %v1738_v45  ;;  %vm498_vm10 = vcmp.eq.s32.totalorder %v1799_v10, %v494_v23 }
 0x10c   : > { %v420_v33 = vmul.f32 %v1692_v43, %v416_v27  ;;  %v417_v42 = vadd.f32 0.2548296, %v413_v37  ;;  %v501_v26 = vsel %vm497_vm9, 1.0, %v1737_v14  ;;  %v502_v30 = vsel %vm498_vm10, 1.0, %v1737_v14 }
 0x10d   : > { %v442_v35 = vmul.f32 %v1698_v32, %v422_v28  ;;  %v423_v41 = vmul.f32 %v1694_v49, %v419_v36  ;;  %v567_v32 = vsel %vm563_vm11, 1.0, %v1737_v14  ;;  %v504_v36 = vpack.c.bf16 %v502_v30, %v501_v26 }
 0x10e   : > { %v440_v38 = vmul.f32 %v1700_v34, %v420_v33  ;;  %v421_v49 = vmul.f32 %v1696_v56, %v417_v42  ;;  %v356_v56 = vmul.f32 0.5, %v1816_v20  ;;  %v568_v33 = vsel %vm564_vm12, 1.0, %v1737_v14 }
 0x10f   : > { %v446_v39 = vsub.f32 1.0, %v442_v35  ;;  %v443_v48 = vmul.f32 %v1702_v44, %v423_v41  ;;  %v753_v34 = vadd.s32 1, %v1797_v9  ;;  %v754_v35 = vadd.s32 1, %v1802_v11 }
 0x110   : > { %v444_v43 = vsub.f32 1.0, %v440_v38  ;;  %v441_v55 = vmul.f32 %v1704_v50, %v421_v49  ;;  %v571_v37 = vpack.c.bf16 %v568_v33, %v567_v32  ;;  %v569_v38 = vsel %vm565_vm13, 1.0, %v1737_v14  ;;  %v1680_v49 = vld [vmem:[%s2025_s2 + $0x8] sm:$0xff]   ;;  %v1681_v50 = vld [vmem:[%s2025_s2] sm:$0xff]  }
 0x111   : > { %v450_v47 = vmul.f32 %v446_v39, %v370_v40  ;;  %v447_v54 = vsub.f32 1.0, %v443_v48  ;;  %vm757_vm15 = vcmp.eq.s32.totalorder %v1799_v10, %v753_v34  ;;  %vm758_vm0 = vcmp.eq.s32.totalorder %v1799_v10, %v754_v35  ;;  %1577 = vmatprep.subr.bf16.mxu1 %v1680_v49 }
 0x112   : > { %v448_v52 = vmul.f32 %v444_v43, %v368_v19  ;;  %v445_v62 = vsub.f32 1.0, %v441_v55  ;;  %v570_v39 = vsel %vm566_vm14, 1.0, %v1737_v14  ;;  %v761_v41 = vsel %vm757_vm15, 1.0, %v1737_v14  ;;  %1578 = vmatpush3.bf16.msra.mxu1 %v1680_v49 }
 0x113   : > { %v454_v53 = vadd.f32 1.0, %v450_v47  ;;  %v451_v61 = vmul.f32 %v447_v54, %v371_v60  ;;  %v762_v42 = vsel %vm758_vm0, 1.0, %v1737_v14  ;;  %v755_v44 = vadd.s32 1, %v487_v3  ;;  %1583 = vmatprep.subr.bf16.mxu1 %v1681_v50 }
 0x114   : > { %v452_v59 = vadd.f32 1.0, %v448_v52  ;;  %v449_v1 = vmul.f32 %v445_v62, %v369_v18  ;;  %v756_v40 = vadd.s32 1, %v488_v4  ;;  %v572_v19 = vpack.c.bf16 %v570_v39, %v569_v38  ;;  %v1682_v18 = vld [vmem:[%s2025_s2 + $0x10] sm:$0xff]  }
 0x115   : > { %v458_v24 = vmul.f32 %v454_v53, %v358_v51  ;;  %v455_v31 = vadd.f32 1.0, %v451_v61  ;;  %v765_v43 = vpack.c.bf16 %v762_v42, %v761_v41  ;;  %vm759_vm1 = vcmp.eq.s32.totalorder %v1799_v10, %v755_v44 }
 0x116   : > { %v456_v63 = vmul.f32 %v452_v59, %v356_v56  ;;  %v453_v20 = vadd.f32 1.0, %v449_v1  ;;  %vm760_vm2 = vcmp.eq.s32.totalorder %v1799_v10, %v756_v40  ;;  %v763_v21 = vsel %vm759_vm1, 1.0, %v1737_v14 }
 0x117   : > { %v466_v5 = vmul.f32 %v463_v57, %v458_v24  ;;  %v459_v6 = vmul.f32 %v455_v31, %v359_v0  ;;  %v764_v47 = vsel %vm760_vm2, 1.0, %v1737_v14  ;;  %vm1739_vm5 = vmmov 0  }
 0x118   : > { %v464_v8 = vmul.f32 %v463_v57, %v456_v63  ;;  %v457_v13 = vmul.f32 %v453_v20, %v357_v7  ;;  %v766_v48 = vpack.c.bf16 %v764_v47, %v763_v21 }
 0x119   : > { %v467_v12 = vmul.f32 %v463_v57, %v459_v6  ;;  %v474_v16 = vadd.f32 %v471_v2, %v466_v5 }
 0x11a   : > { %v465_v22 = vmul.f32 %v463_v57, %v457_v13  ;;  %v472_v25 = vadd.f32 %v471_v2, %v464_v8 }
 0x11b   : > { %v475_v17 = vadd.f32 %v471_v2, %v467_v12 }
 0x11c   : > { %v473_v28 = vadd.f32 %v471_v2, %v465_v22 }
 0x11d   : > { %v483_v27 = vpack.c.bf16 %v475_v17, %v474_v16 }
 0x11e   : > { %v482_v29 = vpack.c.bf16 %v473_v28, %v472_v25 }
 0x120   : > { %1561 = vmatprep.subr.bf16.mxu0 %v482_v29 }
 0x121   : > { %1562 = vmatpush3.bf16.msra.mxu0 %v482_v29 }
 0x122   : > { %1563 = vmatprep.subr.bf16.mxu0 %v483_v27 }
 0x125   : > { %1564 = vmatpush3.bf16.msra.mxu0 %v483_v27 }
 0x126   : > { %1569 = vmatprep.subr.bf16.mxu0 %v482_v29 }
 0x128   : > { %1566 = vmatmul.mubr.msk.bf16.vlgmr.msra.gmra.mrb[4].mxu0 %vm505_vm4, %v504_v36 }
 0x129   : > { %1570 = vmatpush3.bf16.msra.mxu0 %v482_v29  ;;  %1573 = vmatprep.mubr.msk.bf16.mxu0 %vm505_vm4, %v571_v37 }
 0x12a   : > { %1571 = vmatprep.subr.bf16.mxu0 %v483_v27 }
 0x12d   : > { %1572 = vmatpush3.bf16.msra.mxu0 %v483_v27 }
 0x12e   : > { %1589 = vmatprep.subr.bf16.mxu0 %v482_v29 }
 0x130   : > { %1574 = vmatmul.mubr.msk.bf16.vlgmr.msra.gmra.mrb[8].mxu0 %vm505_vm4, %v572_v19 }
 0x131   : > { %1590 = vmatpush3.bf16.msra.mxu0 %v482_v29  ;;  %1593 = vmatprep.mubr.msk.bf16.mxu0 %vm505_vm4, %v765_v43 }
 0x132   : > { %1591 = vmatprep.subr.bf16.mxu0 %v483_v27 }
 0x135   : > { %1592 = vmatpush3.bf16.msra.mxu0 %v483_v27 }
 0x136   : > { %1603 = vmatprep.subr.bf16.mxu0 %v1737_v14 }
 0x138   : > { %1594 = vmatmul.mubr.msk.bf16.vlgmr.msra.gmra.mrb[12].mxu0 %vm505_vm4, %v766_v48 }
 0x139   : > { %1607 = vmatprep.mubr.msk.bf16.mxu0 %vm1739_vm5, %v1737_v14 }
 0x1fb   : > { %v1567_v51 = vpop.f32.mrb[4].mxu0 }
 0x1fc   : > { %v546_v52 = vpop.f32.mrb[5].mxu0 }
 0x1fd   : > { %v1568_v53 = vpop.f32.mrb[6].mxu0 }
 0x1fe   : > { %v562_v54 = vpack.c.bf16 %v1568_v53, %v1567_v51  ;;  %v549_v55 = vpop.f32.mrb[7].mxu0 }
 0x1ff   : > { %v561_v57 = vpack.c.bf16 %v549_v55, %v546_v52 }
 0x203   : > { %v1575_v59 = vpop.f32.mrb[8].mxu0 }
 0x204   : > { %v613_v60 = vpop.f32.mrb[9].mxu0 }
 0x205   : > { %v1576_v24 = vpop.f32.mrb[10].mxu0 }
 0x206   : > { %v629_v56 = vpack.c.bf16 %v1576_v24, %v1575_v59  ;;  %v616_v61 = vpop.f32.mrb[11].mxu0 }
 0x207   : > { %v628_v62 = vpack.c.bf16 %v616_v61, %v613_v60 }
 0x209   : > { %1579 = vmatprep.mubr.msk.bf16.mxu1 %vm636_vm3, %v628_v62 }
 0x20a   : > { %1580 = vmatmul.mubr.msk.bf16.vlgmr.msra.gmra.mrb[0].mxu1 %vm636_vm3, %v629_v56 }
 0x20b   : > { %1584 = vmatpush3.bf16.msra.mxu1 %v1681_v50  ;;  %1585 = vmatprep.mubr.msk.bf16.mxu1 %vm636_vm3, %v561_v57  ;;  %v1595_v63 = vpop.f32.mrb[12].mxu0 }
 0x20c   : > { %1597 = vmatprep.subr.bf16.mxu1 %v1682_v18  ;;  %v807_v0 = vpop.f32.mrb[13].mxu0 }
 0x20d   : > { %v1596_v31 = vpop.f32.mrb[14].mxu0 }
 0x20e   : > { %v823_v1 = vpack.c.bf16 %v1596_v31, %v1595_v63  ;;  %v810_v2 = vpop.f32.mrb[15].mxu0 }
 0x20f   : > { %v822_v3 = vpack.c.bf16 %v810_v2, %v807_v0 }
 0x216   : > { %1586 = vmatmul.mubr.msk.bf16.vlgmr.msra.gmra.mrb[0].mxu1 %vm636_vm3, %v562_v54 }
 0x217   : > { %1598 = vmatpush3.bf16.msra.mxu1 %v1682_v18  ;;  %1599 = vmatprep.mubr.msk.bf16.mxu1 %vm636_vm3, %v822_v3 }
 0x218   : > { %1619 = vmatprep.subr.bf16.mxu1 %v1737_v14 }
 0x222   : > { %1600 = vmatmul.mubr.msk.bf16.vlgmr.msra.gmra.mrb[0].mxu1 %vm636_vm3, %v823_v1 }
 0x223   : > { %1623 = vmatprep.mubr.msk.bf16.mxu1 %vm1739_vm5, %v1737_v14 }
 0x2f5   : > { %v1910_v4 = vpop.f32.mrb[0].mxu1 }
 0x2f6   : > { %v1913_v5 = vmul.f32 0.70710677, %v1910_v4  ;;  %v1915_v6 = vpop.f32.mrb[1].mxu1 }
 0x2f7   : > { %v1918_v7 = vmul.f32 0.70710677, %v1915_v6  ;;  %v1920_v20 = vpop.f32.mrb[2].mxu1 }
 0x2f8   : > { %v907_v8 = vand.u32 2147483647, %v1913_v5  ;;  %v1924_v12 = vmul.f32 0.70710677, %v1920_v20  ;;  %v1927_v15 = vpop.f32.mrb[3].mxu1  ;;  %vm899_vm6 = vcmp.lt.f32.partialorder %v1913_v5, 0.0 }
 0x2f9   : > { %v905_v13 = vand.u32 2147483647, %v1918_v7  ;;  %v1931_v25 = vmul.f32 0.70710677, %v1927_v15  ;;  %vm897_vm7 = vcmp.lt.f32.partialorder %v1918_v7, 0.0 }
 0x2fa   : > { %v911_v16 = vmul.f32 0.3275911, %v907_v8  ;;  %v908_v22 = vand.u32 2147483647, %v1924_v12  ;;  %v959_v33 = vsub.f32 0.0, %v907_v8  ;;  %vm900_vm8 = vcmp.lt.f32.partialorder %v1924_v12, 0.0 }
 0x2fb   : > { %v909_v17 = vmul.f32 0.3275911, %v905_v13  ;;  %v906_v29 = vand.u32 2147483647, %v1931_v25  ;;  %v957_v34 = vsub.f32 0.0, %v905_v13  ;;  %vm898_vm9 = vcmp.lt.f32.partialorder %v1931_v25, 0.0 }
 0x2fc   : > { %v915_v23 = vadd.f32 1.0, %v911_v16  ;;  %v912_v28 = vmul.f32 0.3275911, %v908_v22  ;;  %v963_v36 = vmul.f32 %v959_v33, %v907_v8  ;;  %v960_v37 = vsub.f32 0.0, %v908_v22  ;;  %v281_v5 = vld [vmem:[%s2028_s5] sm:$0x3] }
 0x2fd   : > { %v913_v27 = vadd.f32 1.0, %v909_v17  ;;  %v910_v30 = vmul.f32 0.3275911, %v906_v29  ;;  %v961_v41 = vmul.f32 %v957_v34, %v905_v13  ;;  %v958_v44 = vsub.f32 0.0, %v906_v29 }
 0x2fe   : > { %1705 = vrcp.f32 %v915_v23  ;;  %v916_v26 = vadd.f32 1.0, %v912_v28  ;;  %v969_v43 = vmul.f32 1.442695, %v963_v36  ;;  %v964_v47 = vmul.f32 %v960_v37, %v908_v22 }
 0x2ff   : > { %1707 = vrcp.f32 %v913_v27  ;;  %v914_v32 = vadd.f32 1.0, %v910_v30  ;;  %v965_v49 = vmul.f32 1.442695, %v961_v41  ;;  %v962_v53 = vmul.f32 %v958_v44, %v906_v29 }
 0x300   : > { %1709 = vrcp.f32 %v916_v26  ;;  %v971_v60 = vmul.f32 1.442695, %v964_v47  ;;  %v1004_v25 = vrot.slane %v281_v5, %v1850_v58 }
 0x301   : > { %1711 = vrcp.f32 %v914_v32  ;;  %v967_v18 = vmul.f32 1.442695, %v962_v53  ;;  %v996_v53 = vrot.slane %v281_v5, %v1839_v46 }
 0x302   : > { %1713 = vpow2.f32 %v969_v43 }
 0x303   : > { %1715 = vpow2.f32 %v965_v49 }
 0x304   : > { %1717 = vpow2.f32 %v971_v60 }
 0x305   : > { %1719 = vpow2.f32 %v967_v18  ;;  %v1024_v18 = vmul.u32 2, %v1802_v11 }
 0x307   : > { %vm1078_vm13 = vcmp.eq.s32.totalorder %v1799_v10, %v1024_v18 }
 0x308   : > { %v1706_v35 = vpop.eup %1705 }
 0x309   : > { %v1708_v38 = vpop.eup %1707  ;;  %v923_v39 = vmul.f32 1.0614054, %v1706_v35 }
 0x30a   : > { %v921_v42 = vmul.f32 1.0614054, %v1708_v38  ;;  %v1710_v19 = vpop.eup %1709 }
 0x30b   : > { %v927_v40 = vadd.f32 -1.4531521, %v923_v39  ;;  %v924_v50 = vmul.f32 1.0614054, %v1710_v19  ;;  %v1712_v51 = vpop.eup %1711 }
 0x30c   : > { %v925_v21 = vadd.f32 -1.4531521, %v921_v42  ;;  %v922_v57 = vmul.f32 1.0614054, %v1712_v51  ;;  %v1714_v26 = vpop.eup %1713 }
 0x30d   : > { %v931_v48 = vmul.f32 %v1706_v35, %v927_v40  ;;  %v928_v55 = vadd.f32 -1.4531521, %v924_v50  ;;  %v1716_v32 = vpop.eup %1715  ;;  %v903_v40 = vsel %vm899_vm6, -1.0, %v1738_v45 }
 0x30e   : > { %v929_v52 = vmul.f32 %v1708_v38, %v925_v21  ;;  %v926_v61 = vadd.f32 -1.4531521, %v922_v57  ;;  %v1718_v44 = vpop.eup %1717 }
 0x30f   : > { %v935_v54 = vadd.f32 1.4214138, %v931_v48  ;;  %v932_v56 = vmul.f32 %v1710_v19, %v928_v55  ;;  %v1720_v47 = vpop.eup %1719  ;;  %v891_v48 = vmul.f32 0.5, %v1910_v4  ;;  %v904_v55 = vsel %vm900_vm8, -1.0, %v1738_v45 }
 0x310   : > { %v933_v59 = vadd.f32 1.4214138, %v929_v52  ;;  %v930_v31 = vmul.f32 %v1712_v51, %v926_v61  ;;  %v892_v4 = vmul.f32 0.5, %v1920_v20 }
 0x311   : > { %v939_v24 = vmul.f32 %v1706_v35, %v935_v54  ;;  %v936_v0 = vadd.f32 1.4214138, %v932_v56 }
 0x312   : > { %v937_v62 = vmul.f32 %v1708_v38, %v933_v59  ;;  %v934_v8 = vadd.f32 1.4214138, %v930_v31  ;;  %v889_v59 = vmul.f32 0.5, %v1915_v6  ;;  %v890_v31 = vmul.f32 0.5, %v1927_v15 }
 0x313   : > { %v943_v63 = vadd.f32 -0.28449672, %v939_v24  ;;  %v940_v3 = vmul.f32 %v1710_v19, %v936_v0 }
 0x314   : > { %v941_v1 = vadd.f32 -0.28449672, %v937_v62  ;;  %v938_v22 = vmul.f32 %v1712_v51, %v934_v8  ;;  %v1023_v62 = vmul.u32 2, %v1797_v9 }
 0x315   : > { %v947_v2 = vmul.f32 %v1706_v35, %v943_v63  ;;  %v944_v17 = vadd.f32 -0.28449672, %v940_v3 }
 0x316   : > { %v945_v13 = vmul.f32 %v1708_v38, %v941_v1  ;;  %v942_v29 = vadd.f32 -0.28449672, %v938_v22  ;;  %v1025_v8 = vadd.s32 4294967295, %v1023_v62  ;;  %vm1077_vm12 = vcmp.eq.s32.totalorder %v1799_v10, %v1023_v62 }
 0x317   : > { %v951_v16 = vadd.f32 0.2548296, %v947_v2  ;;  %v948_v28 = vmul.f32 %v1710_v19, %v944_v17 }
 0x318   : > { %v949_v23 = vadd.f32 0.2548296, %v945_v13  ;;  %v946_v36 = vmul.f32 %v1712_v51, %v942_v29  ;;  %v1026_v13 = vadd.s32 4294967295, %v1024_v18  ;;  %vm1027_vm10 = vcmp.eq.s32.totalorder %v1799_v10, %v1025_v8 }
 0x319   : > { %v955_v27 = vmul.f32 %v1706_v35, %v951_v16  ;;  %v952_v34 = vadd.f32 0.2548296, %v948_v28  ;;  %v901_v35 = vsel %vm897_vm7, -1.0, %v1738_v45  ;;  %v1029_v11 = vsel %vm1027_vm10, 1.0, %v1737_v14 }
 0x31a   : > { %v953_v30 = vmul.f32 %v1708_v38, %v949_v23  ;;  %v950_v42 = vadd.f32 0.2548296, %v946_v36  ;;  %vm1028_vm11 = vcmp.eq.s32.totalorder %v1799_v10, %v1026_v13  ;;  %v1079_v29 = vsel %vm1077_vm12, 1.0, %v1737_v14 }
 0x31b   : > { %v975_v33 = vmul.f32 %v1714_v26, %v955_v27  ;;  %v956_v41 = vmul.f32 %v1710_v19, %v952_v34  ;;  %v1030_v15 = vsel %vm1028_vm11, 1.0, %v1737_v14  ;;  %v1080_v26 = vsel %vm1078_vm13, 1.0, %v1737_v14 }
 0x31c   : > { %v973_v37 = vmul.f32 %v1716_v32, %v953_v30  ;;  %v954_v21 = vmul.f32 %v1712_v51, %v950_v42  ;;  %v902_v51 = vsel %vm898_vm9, -1.0, %v1738_v45  ;;  %v1031_v28 = vpack.c.bf16 %v1030_v15, %v1029_v11 }
 0x31d   : > { %v979_v39 = vsub.f32 1.0, %v975_v33  ;;  %v976_v7 = vmul.f32 %v1718_v44, %v956_v41  ;;  %v1239_v30 = vadd.s32 1, %v1023_v62  ;;  %v1240_v32 = vadd.s32 1, %v1024_v18 }
 0x31e   : > { %v977_v43 = vsub.f32 1.0, %v973_v37  ;;  %v974_v52 = vmul.f32 %v1720_v47, %v954_v21  ;;  %v1081_v33 = vpack.c.bf16 %v1080_v26, %v1079_v29 }
 0x31f   : > { %v983_v38 = vmul.f32 %v979_v39, %v903_v40  ;;  %v980_v50 = vsub.f32 1.0, %v976_v7  ;;  %vm1241_vm14 = vcmp.eq.s32.totalorder %v1799_v10, %v1239_v30  ;;  %vm1242_vm15 = vcmp.eq.s32.totalorder %v1799_v10, %v1240_v32  ;;  %v1683_v10 = vld [vmem:[%s2026_s3 + $0x10] sm:$0xff]   ;;  %v1684_v39 = vld [vmem:[%s2026_s3 + $0x18] sm:$0xff]   ;;  %v1685_v7 = vld [vmem:[%s2026_s3] sm:$0xff]  }
 0x320   : > { %v981_v19 = vmul.f32 %v977_v43, %v901_v35  ;;  %v978_v60 = vsub.f32 1.0, %v974_v52  ;;  %v1243_v34 = vsel %vm1241_vm14, 1.0, %v1737_v14  ;;  %v1244_v36 = vsel %vm1242_vm15, 1.0, %v1737_v14  ;;  %1620 = vmatpush3.bf16.msra.mxu1 %v1683_v10 }
 0x321   : > { %v987_v49 = vadd.f32 1.0, %v983_v38  ;;  %v984_v12 = vmul.f32 %v980_v50, %v904_v55  ;;  %v1245_v37 = vpack.c.bf16 %v1244_v36, %v1243_v34  ;;  %1621 = vmatprep.subr.bf16.mxu1 %v1737_v14  ;;  %v1688_v55 = vld [vmem:[%s2026_s3 + $0x28] sm:$0xff]  }
 0x322   : > { %v985_v54 = vadd.f32 1.0, %v981_v19  ;;  %v982_v61 = vmul.f32 %v978_v60, %v902_v51 }
 0x323   : > { %v991_v57 = vmul.f32 %v987_v49, %v891_v48  ;;  %v988_v56 = vadd.f32 1.0, %v984_v12  ;;  %v1686_v48 = vld [vmem:[%s2026_s3 + $0x8] sm:$0xff]  }
 0x324   : > { %v989_v24 = vmul.f32 %v985_v54, %v889_v59  ;;  %v986_v6 = vadd.f32 1.0, %v982_v61  ;;  %1622 = vmatpush3.bf16.msra.mxu1 %v1684_v39  ;;  %v1687_v54 = vld [vmem:[%s2026_s3 + $0x20] sm:$0xff]  }
 0x325   : > { %v999_v63 = vmul.f32 %v996_v53, %v991_v57  ;;  %v992_v0 = vmul.f32 %v988_v56, %v892_v4  ;;  %1627 = vmatprep.subr.bf16.mxu1 %v1737_v14 }
 0x326   : > { %v997_v1 = vmul.f32 %v996_v53, %v989_v24  ;;  %v990_v3 = vmul.f32 %v986_v6, %v890_v31 }
 0x327   : > { %v1000_v2 = vmul.f32 %v996_v53, %v992_v0  ;;  %v1007_v16 = vadd.f32 %v1004_v25, %v999_v63 }
 0x328   : > { %v998_v17 = vmul.f32 %v996_v53, %v990_v3  ;;  %v1005_v22 = vadd.f32 %v1004_v25, %v997_v1 }
 0x329   : > { %v1008_v20 = vadd.f32 %v1004_v25, %v1000_v2 }
 0x32a   : > { %v1006_v23 = vadd.f32 %v1004_v25, %v998_v17 }
 0x32b   : > { %v1022_v27 = vpack.c.bf16 %v1008_v20, %v1007_v16 }
 0x32c   : > { %v1021_v9 = vpack.c.bf16 %v1006_v23, %v1005_v22 }
 0x32e   : > { %1604 = vmatpush3.bf16.msra.mxu0 %v1021_v9 }
 0x32f   : > { %1605 = vmatprep.subr.bf16.mxu0 %v1737_v14 }
 0x332   : > { %1606 = vmatpush3.bf16.msra.mxu0 %v1022_v27 }
 0x333   : > { %1611 = vmatprep.subr.bf16.mxu0 %v1737_v14 }
 0x335   : > { %1608 = vmatmul.mubr.msk.bf16.vlgmr.msra.gmra.mrb[16].mxu0 %vm505_vm4, %v1031_v28 }
 0x336   : > { %1612 = vmatpush3.bf16.msra.mxu0 %v1021_v9  ;;  %1615 = vmatprep.mubr.msk.bf16.mxu0 %vm1739_vm5, %v1737_v14 }
 0x337   : > { %1613 = vmatprep.subr.bf16.mxu0 %v1737_v14 }
 0x33a   : > { %1614 = vmatpush3.bf16.msra.mxu0 %v1022_v27 }
 0x33b   : > { %1635 = vmatprep.subr.bf16.mxu0 %v1737_v14 }
 0x33d   : > { %1616 = vmatmul.mubr.msk.bf16.vlgmr.msra.gmra.mrb[20].mxu0 %vm505_vm4, %v1081_v33 }
 0x33e   : > { %1636 = vmatpush3.bf16.msra.mxu0 %v1021_v9  ;;  %1639 = vmatprep.mubr.msk.bf16.mxu0 %vm1739_vm5, %v1737_v14 }
 0x33f   : > { %1637 = vmatprep.subr.bf16.mxu0 %v1737_v14 }
 0x342   : > { %1638 = vmatpush3.bf16.msra.mxu0 %v1022_v27 }
 0x345   : > { %1640 = vmatmul.mubr.msk.bf16.vlgmr.msra.gmra.mrb[24].mxu0 %vm505_vm4, %v1245_v37 }
 0x408   : > { %v1069_v41 = vpop.f32.mrb[16].mxu0 }
 0x409   : > { %v1609_v42 = vpop.f32.mrb[17].mxu0 }
 0x40a   : > { %v1072_v44 = vpop.f32.mrb[18].mxu0 }
 0x40b   : > { %v1076_v40 = vpack.c.bf16 %v1072_v44, %v1069_v41  ;;  %v1610_v35 = vpop.f32.mrb[19].mxu0  ;;  %v282_v41 = vld [vmem:[%s2029_s6] sm:$0x3] }
 0x410   : > { %v1119_v43 = vpop.f32.mrb[20].mxu0 }
 0x411   : > { %v1617_v5 = vpop.f32.mrb[21].mxu0 }
 0x412   : > { %v1122_v38 = vpop.f32.mrb[22].mxu0 }
 0x413   : > { %v1126_v21 = vpack.c.bf16 %v1122_v38, %v1119_v43  ;;  %v1618_v47 = vpop.f32.mrb[23].mxu0  ;;  %v1404_v38 = vrot.slane %v282_v41, %v1839_v46 }
 0x415   : > { %1624 = vmatmul.mubr.msk.bf16.vlgmr.msra.gmra.mrb[4].mxu1 %vm505_vm4, %v1126_v21 }
 0x416   : > { %1628 = vmatpush3.bf16.msra.mxu1 %v1685_v7  ;;  %1631 = vmatprep.mubr.msk.bf16.mxu1 %vm1739_vm5, %v1737_v14 }
 0x417   : > { %1629 = vmatprep.subr.bf16.mxu1 %v1737_v14 }
 0x418   : > { %v1283_v19 = vpop.f32.mrb[24].mxu0 }
 0x419   : > { %v1641_v49 = vpop.f32.mrb[25].mxu0 }
 0x41a   : > { %1630 = vmatpush3.bf16.msra.mxu1 %v1686_v48  ;;  %v1286_v50 = vpop.f32.mrb[26].mxu0  ;;  %v1410_v48 = vrot.slane %v282_v41, %v1850_v58 }
 0x41b   : > { %1643 = vmatprep.subr.bf16.mxu1 %v1737_v14  ;;  %v1290_v52 = vpack.c.bf16 %v1286_v50, %v1283_v19  ;;  %v1642_v53 = vpop.f32.mrb[27].mxu0 }
 0x421   : > { %1632 = vmatmul.mubr.msk.bf16.vlgmr.msra.gmra.mrb[4].mxu1 %vm505_vm4, %v1076_v40 }
 0x422   : > { %1644 = vmatpush3.bf16.msra.mxu1 %v1687_v54  ;;  %1647 = vmatprep.mubr.msk.bf16.mxu1 %vm1739_vm5, %v1737_v14 }
 0x423   : > { %1645 = vmatprep.subr.bf16.mxu1 %v1737_v14 }
 0x426   : > { %1646 = vmatpush3.bf16.msra.mxu1 %v1688_v55 }
 0x42d   : > { %1648 = vmatmul.mubr.msk.bf16.vlgmr.msra.gmra.mrb[4].mxu1 %vm505_vm4, %v1290_v52 }
 0x500   : > { %v1340_v57 = vpop.f32.mrb[4].mxu1 }
 0x501   : > { %v1351_v59 = vmul.f32 0.70710677, %v1340_v57  ;;  %v1649_v12 = vpop.f32.mrb[5].mxu1  ;;  %v1349_v43 = vmul.f32 0.5, %v1340_v57 }
 0x502   : > { %v1343_v60 = vpop.f32.mrb[6].mxu1 }
 0x503   : > { %v1357_v51 = vand.u32 2147483647, %v1351_v59  ;;  %v1352_v24 = vmul.f32 0.70710677, %v1343_v60  ;;  %v1650_v4 = vpop.f32.mrb[7].mxu1  ;;  %vm1353_vm0 = vcmp.lt.f32.partialorder %v1351_v59, 0.0 }
 0x504   : > { %v1355_v42 = vsel %vm1353_vm0, -1.0, %v1738_v45  ;;  %v1350_v19 = vmul.f32 0.5, %v1343_v60 }
 0x505   : > { %v1359_v56 = vmul.f32 0.3275911, %v1357_v51  ;;  %v1358_v61 = vand.u32 2147483647, %v1352_v24  ;;  %v1383_v63 = vsub.f32 0.0, %v1357_v51  ;;  %vm1354_vm1 = vcmp.lt.f32.partialorder %v1352_v24, 0.0 }
 0x506   : > { %v1356_v7 = vsel %vm1354_vm1, -1.0, %v1738_v45 }
 0x507   : > { %v1361_v25 = vadd.f32 1.0, %v1359_v56  ;;  %v1360_v62 = vmul.f32 0.3275911, %v1358_v61  ;;  %v1384_v0 = vsub.f32 0.0, %v1358_v61  ;;  %v1385_v31 = vmul.f32 %v1383_v63, %v1357_v51 }
 0x509   : > { %1721 = vrcp.f32 %v1361_v25  ;;  %v1362_v18 = vadd.f32 1.0, %v1360_v62  ;;  %v1386_v3 = vmul.f32 %v1384_v0, %v1358_v61  ;;  %v1387_v8 = vmul.f32 1.442695, %v1385_v31 }
 0x50b   : > { %1723 = vrcp.f32 %v1362_v18  ;;  %v1389_v22 = vmul.f32 1.442695, %v1386_v3 }
 0x50c   : > { %1725 = vpow2.f32 %v1387_v8 }
 0x50d   : > { %1727 = vpow2.f32 %v1389_v22 }
 0x513   : > { %v1722_v14 = vpop.eup %1721 }
 0x514   : > { %v1365_v6 = vmul.f32 1.0614054, %v1722_v14 }
 0x515   : > { %v1724_v1 = vpop.eup %1723 }
 0x516   : > { %v1367_v2 = vadd.f32 -1.4531521, %v1365_v6  ;;  %v1366_v13 = vmul.f32 1.0614054, %v1724_v1  ;;  %v1726_v33 = vpop.eup %1725 }
 0x517   : > { %v1728_v10 = vpop.eup %1727 }
 0x518   : > { %v1369_v16 = vmul.f32 %v1722_v14, %v1367_v2  ;;  %v1368_v20 = vadd.f32 -1.4531521, %v1366_v13 }
 0x51a   : > { %v1371_v17 = vadd.f32 1.4214138, %v1369_v16  ;;  %v1370_v23 = vmul.f32 %v1724_v1, %v1368_v20 }
 0x51c   : > { %v1373_v27 = vmul.f32 %v1722_v14, %v1371_v17  ;;  %v1372_v9 = vadd.f32 1.4214138, %v1370_v23 }
 0x51e   : > { %v1375_v11 = vadd.f32 -0.28449672, %v1373_v27  ;;  %v1374_v15 = vmul.f32 %v1724_v1, %v1372_v9 }
 0x520   : > { %v1377_v28 = vmul.f32 %v1722_v14, %v1375_v11  ;;  %v1376_v29 = vadd.f32 -0.28449672, %v1374_v15 }
 0x522   : > { %v1379_v26 = vadd.f32 0.2548296, %v1377_v28  ;;  %v1378_v30 = vmul.f32 %v1724_v1, %v1376_v29 }
 0x524   : > { %v1381_v32 = vmul.f32 %v1722_v14, %v1379_v26  ;;  %v1380_v34 = vadd.f32 0.2548296, %v1378_v30 }
 0x526   : > { %v1391_v36 = vmul.f32 %v1726_v33, %v1381_v32  ;;  %v1382_v37 = vmul.f32 %v1724_v1, %v1380_v34 }
 0x528   : > { %v1393_v39 = vsub.f32 1.0, %v1391_v36  ;;  %v1392_v44 = vmul.f32 %v1728_v10, %v1382_v37 }
 0x52a   : > { %v1395_v40 = vmul.f32 %v1393_v39, %v1355_v42  ;;  %v1394_v35 = vsub.f32 1.0, %v1392_v44 }
 0x52c   : > { %v1397_v5 = vadd.f32 1.0, %v1395_v40  ;;  %v1396_v21 = vmul.f32 %v1394_v35, %v1356_v7 }
 0x52e   : > { %v1399_v47 = vmul.f32 %v1397_v5, %v1349_v43  ;;  %v1398_v49 = vadd.f32 1.0, %v1396_v21 }
 0x530   : > { %v1405_v50 = vmul.f32 %v1404_v38, %v1399_v47  ;;  %v1400_v52 = vmul.f32 %v1398_v49, %v1350_v19 }
 0x532   : > { %v1411_v53 = vadd.f32 %v1410_v48, %v1405_v50  ;;  %v1406_v54 = vmul.f32 %v1404_v38, %v1400_v52 }
 0x534   : > { %1413 = vst.msk [vmem:[%s278_s15] sm:$0xff] %vm505_vm4, %v1411_v53  ;;  %v1412_v46 = vadd.f32 %v1410_v48, %v1406_v54 }
 0x536   : > { %1414 = vst.msk [vmem:[%s278_s15 + $0x8] sm:$0xff] %vm505_vm4, %v1412_v46 }
 0x537 PF: > { %s17_s24 = sadd.s32 1, %s1735_s24  }
 0x538   : > { %p14_p4 = scmp.ge.s32.totalorder %s17_s24, 4  }
 0x53a   :  { %16 = sbr.rel (!%p14_p4) target bundleno = 1 (0x1), region = 78 }

// kernel: conv_transformer_forward.5
= control target key start
LH: loop header
LB: loop body
LE: loop exit
PB: predicated region body
PF: predicated region fallthrough
CT: control target
= control target key end

     0   :  { %s1808_s30 = smov 0   ;;  %s2046_s0 = inlined_call_operand.vmem [shape: f32[2,16,32], index: 0, kind: input, shape index: {}]   ;;  %s2047_s1 = inlined_call_operand.vmem [shape: f32[2,32], index: 1, kind: input, shape index: {}]   ;;  %s2048_s2 = inlined_call_operand.vmem [shape: bf16[32,96], index: 2, kind: input, shape index: {}]   ;;  %s2049_s3 = inlined_call_operand.vmem [shape: bf16[32,32], index: 3, kind: input, shape index: {}]   ;;  %s2050_s4 = inlined_call_operand.vmem [shape: f32[2,32], index: 4, kind: input, shape index: {}]   ;;  %s2051_s5 = inlined_call_operand.vmem [shape: bf16[32,128], index: 5, kind: input, shape index: {}]   ;;  %s2052_s6 = inlined_call_operand.vmem [shape: f32[1,128], index: 6, kind: input, shape index: {}]   ;;  %s2053_s7 = inlined_call_operand.vmem [shape: bf16[128,32], index: 7, kind: input, shape index: {}]   ;;  %s2054_s8 = inlined_call_operand.vmem [shape: f32[1,32], index: 8, kind: input, shape index: {}]   ;;  %s2055_s9 = inlined_call_operand.vmem [shape: f32[2,16,32], index: 9, kind: output, shape index: {}]  }
   0x1 LB: > { %s1466_s10 = sadd.s32 4294967295, %s1742_s30   ;;  %p1470_p0 = scmp.ge.s32.totalorder %s1742_s30, 1  ;;  %s1742_s30 = sphi %s1808_s30, %s19_s30  }
   0x2   : > { %p287_p1 = scmp.lt.s32.totalorder %s1742_s30, 3 }
   0x4   : > { %p288_p2 = pnand %p1470_p0, %p287_p1 }
   0x5   : > { %p323_p3 = scmp.lt.s32.totalorder (!%p288_p2), %s1466_s10, 1  ;;  %vm342_vm0 = vcmask (!%p288_p2), 261120   ;;  %v1676_v14 = vld [vmem:[%s2048_s2] sm:$0xff] (!%p288_p2)   ;;  %v1744_v15 = vmov (!%p288_p2), 0.0   ;;  %v1677_v16 = vld [vmem:[%s2048_s2 + $0x8] sm:$0xff] (!%p288_p2)   ;;  %vm1745_vm1 = vmmov (!%p288_p2), 0   ;;  %v370_v21 = vlaneseq (!%p288_p2) }
   0x6   : > { %291 = sbr.rel (%p288_p2) target bundleno = 4284 (0x10bc), region = 56  ;;  %1546 = vmatprep.subr.bf16.mxu1 (!%p288_p2), %v1744_v15  ;;  %1572 = vmatprep.subr.bf16.mxu0 (!%p288_p2), %v1744_v15  ;;  %v336_v26 = vld [vmem:[%s2047_s1] sm:$0x3] (!%p288_p2)  ;;  %s1746_s21 = smov (!%p288_p2), 96   ;;  %vm447_vm2 = vcmask (!%p288_p2), 64512   ;;  %vm497_vm3 = vcmask (!%p288_p2), 130048  }
   0x7   : > { %1547 = vmatpush3.bf16.msra.mxu1 (!%p288_p2), %v1676_v14  ;;  %1550 = vmatprep.mubr.msk.bf16.mxu1 (!%p288_p2), %vm1745_vm1, %v1744_v15  ;;  %v1850_v24 = vshrl.u32 (!%p288_p2), %v370_v21, 7  ;;  %s1747_s22 = smov (!%p288_p2), 88   ;;  %s1748_s23 = smov (!%p288_p2), 120   ;;  %vm696_vm4 = vcmask (!%p288_p2), 1043456  }
   0x8   : > { %1548 = vmatprep.subr.bf16.mxu1 (!%p288_p2), %v1744_v15  ;;  %1574 = vmatprep.mubr.msk.bf16.mxu0 (!%p288_p2), %vm1745_vm1, %v1744_v15  ;;  %s1749_s24 = smov (!%p288_p2), 64   ;;  %s1750_s25 = smov (!%p288_p2), 80  }
   0x9   : > { %v372_v25 = vsub.s32 (!%p288_p2), 0, %v1850_v24  ;;  %v378_v30 = vsub.s32 (!%p288_p2), 1, %v1850_v24  ;;  %s1751_s26 = smov (!%p288_p2), 112   ;;  %s1752_s27 = smov (!%p288_p2), 56   ;;  %v1681_v24 = vld [vmem:[%s2053_s7 + $0x8] sm:$0xff] (!%p288_p2)  }
   0xa   : > { %s1754_s15 = smov (!%p288_p2), 104   ;;  %s1755_s16 = smov (!%p288_p2), 72  }
   0xb   : > { %1549 = vmatpush3.bf16.msra.mxu1 (!%p288_p2), %v1677_v16  ;;  %v373_v29 = vrot.slane (!%p288_p2), %v336_v26, %v372_v25  ;;  %v379_v34 = vrot.slane (!%p288_p2), %v336_v26, %v378_v30  ;;  %s1756_s19 = smov (!%p288_p2), 40  }
   0xc   : > { %1554 = vmatprep.subr.bf16.mxu1 (!%p288_p2), %v1744_v15 }
   0xd   : > { %s2057_s10 = smov (!%p323_p3, %s1466_s10), 1 }
   0xe   : > { %s1505_s11 = sshll.u32 %s2057_s10, 4 }
   0xf   : > { %s327_s14 = scalar_lea.vmem %s2046_s0, %s1505_s11 }
  0x10   : > { %v1824_v0 = vld [vmem:[%s327_s14] sm:$0xff]  ;;  %v1826_v1 = vld [vmem:[%s327_s14 + $0x8] sm:$0xff]  ;;  %s1753_s14 = smov 48  }
  0x11   : > { %v343_v2 = vsel %vm342_vm0, %v1824_v0, 0.0  ;;  %v346_v3 = vsel %vm342_vm0, %v1826_v1, 0.0 }
  0x12   : > { %344 = vadd.xlane.f32.xlu0 %v343_v2 }
  0x16   : > { %347 = vadd.xlane.f32.xlu0 %v346_v3 }
  0x9f   : > { %v345_v4 = vpop.xlane.xlu0 %344 }
  0xa0   : > { %v350_v5 = vmul.f32 0.03125, %v345_v4 }
  0xa2   : > { %v352_v6 = vsub.f32 %v1824_v0, %v350_v5 }
  0xa3   : > { %v348_v7 = vpop.xlane.xlu0 %347 }
  0xa4   : > { %v351_v8 = vmul.f32 0.03125, %v348_v7  ;;  %v354_v9 = vmul.f32 %v352_v6, %v352_v6 }
  0xa6   : > { %v353_v10 = vsub.f32 %v1826_v1, %v351_v8  ;;  %v356_v11 = vsel %vm342_vm0, %v354_v9, 0.0 }
  0xa7   : > { %357 = vadd.xlane.f32.xlu1 %v356_v11 }
  0xa8   : > { %v355_v12 = vmul.f32 %v353_v10, %v353_v10 }
  0xaa   : > { %v359_v13 = vsel %vm342_vm0, %v355_v12, 0.0 }
  0xab   : > { %360 = vadd.xlane.f32.xlu1 %v359_v13 }
 0x134   : > { %v358_v17 = vpop.xlane.xlu1 %357 }
 0x135   : > { %v362_v18 = vmul.f32 0.03125, %v358_v17 }
 0x137   : > { %v364_v19 = vadd.f32 1e-05, %v362_v18 }
 0x138   : > { %v361_v20 = vpop.xlane.xlu1 %360 }
 0x139   : > { %1688 = vrsqrt.f32 %v364_v19  ;;  %v363_v22 = vmul.f32 0.03125, %v361_v20 }
 0x13b   : > { %v365_v23 = vadd.f32 1e-05, %v363_v22 }
 0x13d   : > { %1690 = vrsqrt.f32 %v365_v23 }
 0x143   : > { %v1689_v27 = vpop.eup %1688 }
 0x144   : > { %v368_v28 = vmul.f32 %v1689_v27, %v352_v6 }
 0x146   : > { %v374_v33 = vmul.f32 %v373_v29, %v368_v28 }
 0x147   : > { %v1691_v31 = vpop.eup %1690 }
 0x148   : > { %v369_v32 = vmul.f32 %v1691_v31, %v353_v10  ;;  %v380_v36 = vadd.f32 %v379_v34, %v374_v33 }
 0x14a   : > { %v375_v35 = vmul.f32 %v373_v29, %v369_v32 }
 0x14c   : > { %v381_v37 = vadd.f32 %v379_v34, %v375_v35 }
 0x14e   : > { %v382_v38 = vpack.c.bf16 %v381_v37, %v380_v36 }
 0x150   : > { %1551 = vmatmul.mubr.msk.bf16.vlgmr.msra.gmra.mrb[0].mxu1 %vm342_vm0, %v382_v38 }
 0x151   : > { %1556 = vmatprep.mubr.msk.bf16.mxu1 %vm1745_vm1, %v1744_v15 }
 0x223   : > { %v436_v39 = vpop.f32.mrb[0].mxu1 }
 0x224   : > { %v1552_v40 = vpop.f32.mrb[1].mxu1 }
 0x225   : > { %v439_v41 = vpop.f32.mrb[2].mxu1  ;;  %v339_v40 = vld [vmem:[%s2049_s3 + $0x4] sm:$0xf] }
 0x226   : > { %v1864_v42 = vpack.c.bf16 %v439_v41, %v436_v39  ;;  %v1553_v43 = vpop.f32.mrb[3].mxu1  ;;  %v698_v41 = vsel %vm696_vm4, %v339_v40, 0 }
 0x228   : > { %445 = vrot.lane.b32.xlu0 %v1864_v42, %s1746_s21 }
 0x22c   : > { %571 = vrot.lane.b32.xlu0 %v1864_v42, %s1747_s22 }
 0x230   : > { %569 = vrot.lane.b32.xlu0 %v1864_v42, %s1748_s23 }
 0x29a   : > { %v446_v44 = vpop.permute.xlu0 %445 }
 0x29b   : > { %v452_v45 = vsel %vm447_vm2, %v446_v44, 0 }
 0x29c   : > { %1555 = vmatpush3.bf16.xpose.msra.mxu1 %v452_v45 }
 0x29d   : > { %1560 = vmatprep.subr.bf16.mxu1 %v1744_v15 }
 0x29e   : > { %v572_v9 = vpop.permute.xlu0 %571 }
 0x29f   : > { %v577_v11 = vsel %vm447_vm2, %v572_v9, 0 }
 0x2a2   : > { %v570_v12 = vpop.permute.xlu0 %569 }
 0x2a3   : > { %1557 = vmatmul.mubr.msk.bf16.vlgmr.msra.gmra.mrb[4].mxu1 %vm447_vm2, %v1864_v42 }
 0x2a4   : > { %1562 = vmatprep.mubr.msk.bf16.mxu1 %vm1745_vm1, %v1744_v15 }
 0x376   : > { %v488_v46 = vpop.f32.mrb[4].mxu1 }
 0x377   : > { %v495_v47 = vmul.f32 0.35355338, %v488_v46  ;;  %v1558_v48 = vpop.f32.mrb[5].mxu1 }
 0x378   : > { %v491_v49 = vpop.f32.mrb[6].mxu1  ;;  %v338_v48 = vld [vmem:[%s2049_s3] sm:$0xf] }
 0x379   : > { %v496_v50 = vmul.f32 0.35355338, %v491_v49  ;;  %v1559_v51 = vpop.f32.mrb[7].mxu1  ;;  %v498_v52 = vsel %vm497_vm3, %v495_v47, -inf }
 0x37a   : > { %499 = vmax.xlane.f32.xlu1 %v498_v52  ;;  %v745_v52 = vsel %vm696_vm4, %v338_v48, 0 }
 0x37b   : > { %v501_v53 = vsel %vm497_vm3, %v496_v50, -inf }
 0x37e   : > { %502 = vmax.xlane.f32.xlu1 %v501_v53 }
 0x407   : > { %v500_v54 = vpop.xlane.xlu1 %499 }
 0x408   : > { %v504_v55 = vsub.f32 %v495_v47, %v500_v54 }
 0x40a   : > { %v506_v56 = vmul.f32 1.442695, %v504_v55 }
 0x40b   : > { %v503_v57 = vpop.xlane.xlu1 %502 }
 0x40c   : > { %1692 = vpow2.f32 %v506_v56  ;;  %v505_v58 = vsub.f32 %v496_v50, %v503_v57 }
 0x40e   : > { %v508_v59 = vmul.f32 1.442695, %v505_v58 }
 0x410   : > { %1694 = vpow2.f32 %v508_v59 }
 0x416   : > { %v1693_v60 = vpop.eup %1692 }
 0x417   : > { %v510_v61 = vsel %vm497_vm3, %v1693_v60, 0.0 }
 0x418   : > { %511 = vadd.xlane.f32.xlu1 %v510_v61 }
 0x41a   : > { %v1695_v62 = vpop.eup %1694 }
 0x41b   : > { %v513_v63 = vsel %vm497_vm3, %v1695_v62, 0.0 }
 0x41c   : > { %514 = vadd.xlane.f32.xlu1 %v513_v63 }
 0x42d   : > { %521 = vrot.lane.b32.xlu1 %v1864_v42, %s1749_s24 }
 0x4a5   : > { %v512_v2 = vpop.xlane.xlu1 %511 }
 0x4a6   : > { %1696 = vrcp.f32 %v512_v2 }
 0x4a9   : > { %v515_v3 = vpop.xlane.xlu1 %514 }
 0x4aa   : > { %1698 = vrcp.f32 %v515_v3 }
 0x4ad   : > { %v522_v4 = vpop.permute.xlu1 %521 }
 0x4ae   : > { %1561 = vmatpush3.bf16.msra.mxu1 %v522_v4 }
 0x4af   : > { %1566 = vmatprep.subr.bf16.mxu1 %v1744_v15 }
 0x4b0   : > { %v1697_v5 = vpop.eup %1696 }
 0x4b1   : > { %v518_v7 = vmul.f32 %v1697_v5, %v1693_v60 }
 0x4b4   : > { %v1699_v6 = vpop.eup %1698 }
 0x4b5   : > { %v519_v8 = vmul.f32 %v1699_v6, %v1695_v62 }
 0x4b7   : > { %v520_v10 = vpack.c.bf16 %v519_v8, %v518_v7 }
 0x4b9   : > { %1563 = vmatmul.mubr.msk.bf16.vlgmr.msra.gmra.mrb[8].mxu1 %vm497_vm3, %v520_v10 }
 0x4ba   : > { %1567 = vmatpush3.bf16.xpose.msra.mxu1 %v577_v11  ;;  %1568 = vmatprep.mubr.msk.bf16.mxu1 %vm1745_vm1, %v1744_v15 }
 0x4bb   : > { %1578 = vmatprep.subr.bf16.mxu1 %v1744_v15 }
 0x4c1   : > { %1569 = vmatmul.mubr.msk.bf16.vlgmr.msra.gmra.mrb[12].mxu1 %vm447_vm2, %v570_v12 }
 0x4c2   : > { %1580 = vmatprep.mubr.msk.bf16.mxu1 %vm1745_vm1, %v1744_v15  ;;  %1579 = vmatpush3.bf16.msra.mxu1 %v698_v41 }
 0x4c3   : > { %1590 = vmatprep.subr.bf16.mxu1 %v1744_v15 }
 0x58c   : > { %v561_v13 = vpop.f32.mrb[8].mxu1 }
 0x58d   : > { %v1564_v14 = vpop.f32.mrb[9].mxu1 }
 0x58e   : > { %v564_v16 = vpop.f32.mrb[10].mxu1 }
 0x58f   : > { %v568_v17 = vpack.c.bf16 %v564_v16, %v561_v13  ;;  %v1565_v18 = vpop.f32.mrb[11].mxu1 }
 0x594   : > { %v613_v19 = vpop.f32.mrb[12].mxu1 }
 0x595   : > { %v620_v20 = vmul.f32 0.35355338, %v613_v19  ;;  %v1570_v21 = vpop.f32.mrb[13].mxu1 }
 0x596   : > { %v616_v22 = vpop.f32.mrb[14].mxu1 }
 0x597   : > { %v621_v23 = vmul.f32 0.35355338, %v616_v22  ;;  %v1571_v26 = vpop.f32.mrb[15].mxu1  ;;  %v622_v27 = vsel %vm497_vm3, %v620_v20, -inf }
 0x598   : > { %623 = vmax.xlane.f32.xlu0 %v622_v27 }
 0x599   : > { %v625_v28 = vsel %vm497_vm3, %v621_v23, -inf }
 0x59a   : > { %626 = vmax.xlane.f32.xlu1 %v625_v28 }
 0x5ab   : > { %790 = vrot.lane.b32.xlu1 %v1864_v42, %s1750_s25 }
 0x5af   : > { %788 = vrot.lane.b32.xlu1 %v1864_v42, %s1751_s26 }
 0x625   : > { %v624_v29 = vpop.xlane.xlu0 %623 }
 0x626   : > { %v628_v31 = vsub.f32 %v620_v20, %v624_v29 }
 0x627   : > { %v627_v32 = vpop.xlane.xlu1 %626 }
 0x628   : > { %v630_v33 = vmul.f32 1.442695, %v628_v31  ;;  %v629_v34 = vsub.f32 %v621_v23, %v627_v32 }
 0x62a   : > { %1700 = vpow2.f32 %v630_v33  ;;  %v632_v35 = vmul.f32 1.442695, %v629_v34 }
 0x62b   : > { %v791_v55 = vpop.permute.xlu1 %790 }
 0x62c   : > { %1702 = vpow2.f32 %v632_v35  ;;  %v796_v59 = vsel %vm447_vm2, %v791_v55, 0 }
 0x62f   : > { %v789_v2 = vpop.permute.xlu1 %788 }
 0x634   : > { %v1701_v36 = vpop.eup %1700 }
 0x635   : > { %v634_v37 = vsel %vm497_vm3, %v1701_v36, 0.0 }
 0x636   : > { %v1703_v38 = vpop.eup %1702  ;;  %635 = vadd.xlane.f32.xlu0 %v634_v37 }
 0x637   : > { %v637_v39 = vsel %vm497_vm3, %v1703_v38, 0.0 }
 0x63a   : > { %638 = vadd.xlane.f32.xlu0 %v637_v39 }
 0x650   : > { %645 = vrot.lane.b32.xlu0 %v1864_v42, %s1752_s27 }
 0x6c3   : > { %v636_v43 = vpop.xlane.xlu0 %635 }
 0x6c4   : > { %1704 = vrcp.f32 %v636_v43  ;;  %v340_v43 = vld [vmem:[%s2049_s3 + $0x8] sm:$0xf] }
 0x6c7   : > { %v639_v44 = vpop.xlane.xlu0 %638 }
 0x6c8   : > { %1706 = vrcp.f32 %v639_v44  ;;  %v916_v44 = vsel %vm696_vm4, %v340_v43, 0 }
 0x6cb   : > { %v646_v45 = vpop.permute.xlu0 %645 }
 0x6cc   : > { %1573 = vmatpush3.bf16.msra.mxu0 %v646_v45 }
 0x6cd   : > { %1584 = vmatprep.subr.bf16.mxu0 %v1744_v15 }
 0x6ce   : > { %v1705_v46 = vpop.eup %1704 }
 0x6cf   : > { %v642_v49 = vmul.f32 %v1705_v46, %v1701_v36 }
 0x6d2   : > { %v1707_v47 = vpop.eup %1706 }
 0x6d3   : > { %v643_v50 = vmul.f32 %v1707_v47, %v1703_v38 }
 0x6d5   : > { %v644_v51 = vpack.c.bf16 %v643_v50, %v642_v49 }
 0x6d7   : > { %1575 = vmatmul.mubr.msk.bf16.vlgmr.msra.gmra.mrb[0].mxu0 %vm497_vm3, %v644_v51 }
 0x6d8   : > { %1585 = vmatpush3.bf16.msra.mxu0 %v745_v52  ;;  %1586 = vmatprep.mubr.msk.bf16.mxu0 %vm1745_vm1, %v1744_v15 }
 0x6d9   : > { %1596 = vmatprep.subr.bf16.mxu0 %v1744_v15 }
 0x6df   : > { %1587 = vmatmul.mubr.msk.bf16.vlgmr.msra.gmra.mrb[4].mxu0 %vm447_vm2, %v568_v17 }
 0x6e0   : > { %1598 = vmatprep.mubr.msk.bf16.mxu0 %vm1745_vm1, %v1744_v15 }
 0x7aa   : > { %v685_v53 = vpop.f32.mrb[0].mxu0 }
 0x7ab   : > { %v1576_v54 = vpop.f32.mrb[1].mxu0 }
 0x7ac   : > { %v688_v56 = vpop.f32.mrb[2].mxu0 }
 0x7ad   : > { %v692_v57 = vpack.c.bf16 %v688_v56, %v685_v53  ;;  %v1577_v58 = vpop.f32.mrb[3].mxu0 }
 0x7af   : > { %1581 = vmatmul.mubr.msk.bf16.vlgmr.msra.gmra.mrb[16].mxu1 %vm447_vm2, %v692_v57 }
 0x7b0   : > { %1591 = vmatpush3.bf16.xpose.msra.mxu1 %v796_v59  ;;  %1592 = vmatprep.mubr.msk.bf16.mxu1 %vm1745_vm1, %v1744_v15 }
 0x7b1   : > { %1602 = vmatprep.subr.bf16.mxu1 %v1744_v15 }
 0x7b2   : > { %v781_v60 = vpop.f32.mrb[4].mxu0 }
 0x7b3   : > { %v1588_v61 = vpop.f32.mrb[5].mxu0 }
 0x7b4   : > { %v784_v62 = vpop.f32.mrb[6].mxu0 }
 0x7b5   : > { %v1589_v63 = vpop.f32.mrb[7].mxu0 }
 0x7b7   : > { %1593 = vmatmul.mubr.msk.bf16.vlgmr.msra.gmra.mrb[20].mxu1 %vm447_vm2, %v789_v2 }
 0x7b8   : > { %1604 = vmatprep.mubr.msk.bf16.mxu1 %vm1745_vm1, %v1744_v15  ;;  %1603 = vmatpush3.bf16.msra.mxu1 %v916_v44 }
 0x7b9   : > { %1614 = vmatprep.subr.bf16.mxu1 %v1744_v15 }
 0x882   : > { %v734_v3 = vpop.f32.mrb[16].mxu1 }
 0x883   : > { %v1921_v4 = vadd.f32 %v781_v60, %v734_v3  ;;  %v1582_v5 = vpop.f32.mrb[17].mxu1 }
 0x884   : > { %v737_v6 = vpop.f32.mrb[18].mxu1 }
 0x885   : > { %v1923_v7 = vadd.f32 %v784_v62, %v737_v6  ;;  %v1583_v8 = vpop.f32.mrb[19].mxu1 }
 0x886   : > { %v341_v8 = vld [vmem:[%s2049_s3 + $0xc] sm:$0xf] }
 0x88a   : > { %v832_v9 = vpop.f32.mrb[20].mxu1 }
 0x88b   : > { %v839_v10 = vmul.f32 0.35355338, %v832_v9  ;;  %v1594_v11 = vpop.f32.mrb[21].mxu1  ;;  %v1089_v9 = vsel %vm696_vm4, %v341_v8, 0 }
 0x88c   : > { %v835_v12 = vpop.f32.mrb[22].mxu1 }
 0x88d   : > { %v840_v13 = vmul.f32 0.35355338, %v835_v12  ;;  %v1595_v14 = vpop.f32.mrb[23].mxu1  ;;  %v841_v16 = vsel %vm497_vm3, %v839_v10, -inf }
 0x88e   : > { %842 = vmax.xlane.f32.xlu1 %v841_v16 }
 0x88f   : > { %v844_v17 = vsel %vm497_vm3, %v840_v13, -inf }
 0x890   : > { %845 = vmax.xlane.f32.xlu0 %v844_v17 }
 0x89f   : > { %864 = vrot.lane.b32.xlu1 %v1864_v42, %s1753_s14  ;;  %s332_s14 = scalar_lea.vmem %s2055_s9, %s1505_s11 }
 0x8a3   : > { %961 = vrot.lane.b32.xlu1 %v1864_v42, %s1754_s15 }
 0x91b   : > { %v843_v18 = vpop.xlane.xlu1 %842 }
 0x91c   : > { %v847_v19 = vsub.f32 %v839_v10, %v843_v18 }
 0x91d   : > { %v846_v20 = vpop.xlane.xlu0 %845 }
 0x91e   : > { %v849_v21 = vmul.f32 1.442695, %v847_v19  ;;  %v848_v22 = vsub.f32 %v840_v13, %v846_v20 }
 0x91f   : > { %v865_v23 = vpop.permute.xlu1 %864 }
 0x920   : > { %1708 = vpow2.f32 %v849_v21  ;;  %v851_v26 = vmul.f32 1.442695, %v848_v22  ;;  %1597 = vmatpush3.bf16.msra.mxu0 %v865_v23 }
 0x921   : > { %1608 = vmatprep.subr.bf16.mxu0 %v1744_v15 }
 0x922   : > { %1710 = vpow2.f32 %v851_v26 }
 0x923   : > { %v962_v41 = vpop.permute.xlu1 %961 }
 0x92a   : > { %v1709_v27 = vpop.eup %1708 }
 0x92b   : > { %v853_v28 = vsel %vm497_vm3, %v1709_v27, 0.0 }
 0x92c   : > { %v1711_v29 = vpop.eup %1710  ;;  %854 = vadd.xlane.f32.xlu0 %v853_v28 }
 0x92d   : > { %v856_v31 = vsel %vm497_vm3, %v1711_v29, 0.0 }
 0x930   : > { %857 = vadd.xlane.f32.xlu0 %v856_v31 }
 0x946   : > { %963 = vrot.lane.b32.xlu0 %v1864_v42, %s1755_s16 }
 0x9b9   : > { %v855_v32 = vpop.xlane.xlu0 %854 }
 0x9ba   : > { %1712 = vrcp.f32 %v855_v32 }
 0x9bd   : > { %v858_v33 = vpop.xlane.xlu0 %857 }
 0x9be   : > { %1714 = vrcp.f32 %v858_v33 }
 0x9c1   : > { %v964_v38 = vpop.permute.xlu0 %963 }
 0x9c2   : > { %v969_v40 = vsel %vm447_vm2, %v964_v38, 0 }
 0x9c4   : > { %v1713_v34 = vpop.eup %1712 }
 0x9c5   : > { %v861_v36 = vmul.f32 %v1713_v34, %v1709_v27 }
 0x9c8   : > { %v1715_v35 = vpop.eup %1714 }
 0x9c9   : > { %v862_v37 = vmul.f32 %v1715_v35, %v1711_v29 }
 0x9cb   : > { %v863_v39 = vpack.c.bf16 %v862_v37, %v861_v36 }
 0x9cd   : > { %1599 = vmatmul.mubr.msk.bf16.vlgmr.msra.gmra.mrb[8].mxu0 %vm497_vm3, %v863_v39 }
 0x9ce   : > { %1609 = vmatpush3.bf16.xpose.msra.mxu0 %v969_v40  ;;  %1610 = vmatprep.mubr.msk.bf16.mxu0 %vm1745_vm1, %v1744_v15 }
 0x9cf   : > { %1620 = vmatprep.subr.bf16.mxu0 %v1744_v15 }
 0x9d5   : > { %1611 = vmatmul.mubr.msk.bf16.vlgmr.msra.gmra.mrb[12].mxu0 %vm447_vm2, %v962_v41 }
 0x9d6   : > { %1622 = vmatprep.mubr.msk.bf16.mxu0 %vm1745_vm1, %v1744_v15  ;;  %1621 = vmatpush3.bf16.msra.mxu0 %v1089_v9  ;;  %v1680_v9 = vld [vmem:[%s2053_s7] sm:$0xff]  }
 0x9d7   : > { %1634 = vmatprep.subr.bf16.mxu0 %v1744_v15 }
 0xaa0   : > { %v904_v45 = vpop.f32.mrb[8].mxu0 }
 0xaa1   : > { %v1600_v46 = vpop.f32.mrb[9].mxu0 }
 0xaa2   : > { %v907_v47 = vpop.f32.mrb[10].mxu0 }
 0xaa3   : > { %v911_v48 = vpack.c.bf16 %v907_v47, %v904_v45  ;;  %v1601_v49 = vpop.f32.mrb[11].mxu0 }
 0xaa4   : > { %v1678_v49 = vld [vmem:[%s2051_s5] sm:$0xff]  }
 0xaa5   : > { %1605 = vmatmul.mubr.msk.bf16.vlgmr.msra.gmra.mrb[24].mxu1 %vm447_vm2, %v911_v48 }
 0xaa6   : > { %1616 = vmatprep.mubr.msk.bf16.mxu1 %vm1745_vm1, %v1744_v15 }
 0xaa8   : > { %v1005_v50 = vpop.f32.mrb[12].mxu0 }
 0xaa9   : > { %v1012_v51 = vmul.f32 0.35355338, %v1005_v50  ;;  %v1612_v52 = vpop.f32.mrb[13].mxu0  ;;  %v1679_v50 = vld [vmem:[%s2051_s5 + $0x8] sm:$0xff]  }
 0xaaa   : > { %v1008_v53 = vpop.f32.mrb[14].mxu0 }
 0xaab   : > { %v1013_v54 = vmul.f32 0.35355338, %v1008_v53  ;;  %v1613_v55 = vpop.f32.mrb[15].mxu0  ;;  %v1014_v56 = vsel %vm497_vm3, %v1012_v51, -inf }
 0xaac   : > { %1015 = vmax.xlane.f32.xlu1 %v1014_v56 }
 0xaad   : > { %v1017_v57 = vsel %vm497_vm3, %v1013_v54, -inf }
 0xaae   : > { %1018 = vmax.xlane.f32.xlu0 %v1017_v57  ;;  %v337_v57 = vld [vmem:[%s2050_s4] sm:$0x3] }
 0xb39   : > { %v1016_v58 = vpop.xlane.xlu1 %1015 }
 0xb3a   : > { %v1020_v59 = vsub.f32 %v1012_v51, %v1016_v58 }
 0xb3b   : > { %v1019_v60 = vpop.xlane.xlu0 %1018 }
 0xb3c   : > { %v1022_v61 = vmul.f32 1.442695, %v1020_v59  ;;  %v1021_v62 = vsub.f32 %v1013_v54, %v1019_v60  ;;  %v1165_v59 = vrot.slane %v337_v57, %v372_v25  ;;  %v1682_v25 = vld [vmem:[%s2053_s7 + $0x10] sm:$0xff]  }
 0xb3e   : > { %1716 = vpow2.f32 %v1022_v61  ;;  %v1024_v63 = vmul.f32 1.442695, %v1021_v62  ;;  %v1171_v62 = vrot.slane %v337_v57, %v378_v30  ;;  %v1683_v30 = vld [vmem:[%s2053_s7 + $0x18] sm:$0xff]  }
 0xb40   : > { %1718 = vpow2.f32 %v1024_v63 }
 0xb48   : > { %v1717_v2 = vpop.eup %1716 }
 0xb49   : > { %v1026_v3 = vsel %vm497_vm3, %v1717_v2, 0.0 }
 0xb4a   : > { %v1719_v5 = vpop.eup %1718  ;;  %1027 = vadd.xlane.f32.xlu0 %v1026_v3 }
 0xb4b   : > { %v1029_v6 = vsel %vm497_vm3, %v1719_v5, 0.0 }
 0xb4c   : > { %1030 = vadd.xlane.f32.xlu1 %v1029_v6 }
 0xb60   : > { %1037 = vrot.lane.b32.xlu0 %v1864_v42, %s1756_s19 }
 0xb78   : > { %v952_v10 = vpop.f32.mrb[24].mxu1 }
 0xb79   : > { %v959_v11 = vadd.f32 %v952_v10, %v1921_v4  ;;  %v1606_v12 = vpop.f32.mrb[25].mxu1  ;;  %v1684_v10 = vld [vmem:[%s2053_s7 + $0x20] sm:$0xff]  }
 0xb7a   : > { %v955_v13 = vpop.f32.mrb[26].mxu1  ;;  %v1686_v12 = vld [vmem:[%s2053_s7 + $0x30] sm:$0xff]  }
 0xb7b   : > { %v960_v14 = vadd.f32 %v955_v13, %v1923_v7  ;;  %v1607_v16 = vpop.f32.mrb[27].mxu1  ;;  %v1687_v13 = vld [vmem:[%s2053_s7 + $0x38] sm:$0xff]  }
 0xbd7   : > { %v1028_v17 = vpop.xlane.xlu0 %1027 }
 0xbd8   : > { %1720 = vrcp.f32 %v1028_v17 }
 0xbd9   : > { %v1031_v42 = vpop.xlane.xlu1 %1030 }
 0xbda   : > { %1722 = vrcp.f32 %v1031_v42 }
 0xbdb   : > { %v1038_v18 = vpop.permute.xlu0 %1037 }
 0xbdc   : > { %1615 = vmatpush3.bf16.msra.mxu1 %v1038_v18 }
 0xbdd   : > { %1626 = vmatprep.subr.bf16.mxu1 %v1744_v15 }
 0xbe2   : > { %v1721_v19 = vpop.eup %1720 }
 0xbe3   : > { %v1034_v21 = vmul.f32 %v1721_v19, %v1717_v2 }
 0xbe4   : > { %v1723_v20 = vpop.eup %1722 }
 0xbe5   : > { %v1035_v22 = vmul.f32 %v1723_v20, %v1719_v5 }
 0xbe7   : > { %v1036_v23 = vpack.c.bf16 %v1035_v22, %v1034_v21 }
 0xbe9   : > { %1617 = vmatmul.mubr.msk.bf16.vlgmr.msra.gmra.mrb[28].mxu1 %vm497_vm3, %v1036_v23 }
 0xbea   : > { %1630 = vmatprep.mubr.msk.bf16.mxu1 %vm1745_vm1, %v1744_v15  ;;  %1627 = vmatpush3.bf16.msra.mxu1 %v1678_v49 }
 0xbeb   : > { %1628 = vmatprep.subr.bf16.mxu1 %v1744_v15 }
 0xbee   : > { %1629 = vmatpush3.bf16.msra.mxu1 %v1679_v50 }
 0xcbc   : > { %v1077_v4 = vpop.f32.mrb[28].mxu1 }
 0xcbd   : > { %v1618_v7 = vpop.f32.mrb[29].mxu1 }
 0xcbe   : > { %v1080_v26 = vpop.f32.mrb[30].mxu1 }
 0xcbf   : > { %v1084_v27 = vpack.c.bf16 %v1080_v26, %v1077_v4  ;;  %v1619_v28 = vpop.f32.mrb[31].mxu1 }
 0xcc1   : > { %1623 = vmatmul.mubr.msk.bf16.vlgmr.msra.gmra.mrb[16].mxu0 %vm447_vm2, %v1084_v27 }
 0xcc2   : > { %1650 = vmatprep.mubr.msk.bf16.mxu0 %vm1745_vm1, %v1744_v15  ;;  %1635 = vmatpush3.bf16.msra.mxu0 %v1680_v9 }
 0xcc3   : > { %1636 = vmatprep.subr.bf16.mxu0 %v1744_v15 }
 0xcc6   : > { %1637 = vmatpush3.bf16.msra.mxu0 %v1681_v24 }
 0xcc7   : > { %1638 = vmatprep.subr.bf16.mxu0 %v1744_v15 }
 0xcca   : > { %1639 = vmatpush3.bf16.msra.mxu0 %v1682_v25 }
 0xccb   : > { %1640 = vmatprep.subr.bf16.mxu0 %v1744_v15 }
 0xcce   : > { %1641 = vmatpush3.bf16.msra.mxu0 %v1683_v30 }
 0xccf   : > { %1642 = vmatprep.subr.bf16.mxu0 %v1744_v15 }
 0xcd2   : > { %1643 = vmatpush3.bf16.msra.mxu0 %v1684_v10 }
 0xcd3   : > { %1644 = vmatprep.subr.bf16.mxu0 %v1744_v15 }
 0xd94   : > { %v1125_v29 = vpop.f32.mrb[16].mxu0 }
 0xd95   : > { %v1132_v31 = vadd.f32 %v1125_v29, %v959_v11  ;;  %v1624_v32 = vpop.f32.mrb[17].mxu0  ;;  %v1685_v11 = vld [vmem:[%s2053_s7 + $0x28] sm:$0xff]  }
 0xd96   : > { %v1128_v33 = vpop.f32.mrb[18].mxu0  ;;  %1645 = vmatpush3.bf16.msra.mxu0 %v1685_v11  ;;  %v1494_v11 = vld [vmem:[%s2054_s8] ss:$0 sm:$0xff] }
 0xd97   : > { %v1969_v34 = vadd.f32 %v1132_v31, %v1824_v0  ;;  %v1133_v35 = vadd.f32 %v1128_v33, %v960_v14  ;;  %v1625_v36 = vpop.f32.mrb[19].mxu0  ;;  %1646 = vmatprep.subr.bf16.mxu0 %v1744_v15  ;;  %v1490_v14 = vld [vmem:[%s2052_s6] ss:$0 sm:$0xff] }
 0xd99   : > { %v1972_v37 = vadd.f32 %v1133_v35, %v1826_v1  ;;  %v1136_v38 = vsel %vm342_vm0, %v1969_v34, 0.0 }
 0xd9a   : > { %1137 = vadd.xlane.f32.xlu1 %v1136_v38  ;;  %1647 = vmatpush3.bf16.msra.mxu0 %v1686_v12 }
 0xd9b   : > { %v1139_v39 = vsel %vm342_vm0, %v1972_v37, 0.0  ;;  %1648 = vmatprep.subr.bf16.mxu0 %v1744_v15 }
 0xd9e   : > { %1140 = vadd.xlane.f32.xlu1 %v1139_v39  ;;  %1649 = vmatpush3.bf16.msra.mxu0 %v1687_v13 }
 0xe27   : > { %v1138_v40 = vpop.xlane.xlu1 %1137 }
 0xe28   : > { %v1142_v41 = vmul.f32 0.03125, %v1138_v40 }
 0xe2a   : > { %v1144_v43 = vsub.f32 %v1969_v34, %v1142_v41 }
 0xe2b   : > { %v1141_v44 = vpop.xlane.xlu1 %1140 }
 0xe2c   : > { %v1143_v0 = vmul.f32 0.03125, %v1141_v44  ;;  %v1146_v45 = vmul.f32 %v1144_v43, %v1144_v43 }
 0xe2e   : > { %v1145_v46 = vsub.f32 %v1972_v37, %v1143_v0  ;;  %v1148_v1 = vsel %vm342_vm0, %v1146_v45, 0.0 }
 0xe2f   : > { %1149 = vadd.xlane.f32.xlu1 %v1148_v1 }
 0xe30   : > { %v1147_v47 = vmul.f32 %v1145_v46, %v1145_v46 }
 0xe32   : > { %v1151_v48 = vsel %vm342_vm0, %v1147_v47, 0.0 }
 0xe33   : > { %1152 = vadd.xlane.f32.xlu1 %v1151_v48 }
 0xebc   : > { %v1150_v51 = vpop.xlane.xlu1 %1149 }
 0xebd   : > { %v1154_v52 = vmul.f32 0.03125, %v1150_v51 }
 0xebf   : > { %v1156_v53 = vadd.f32 1e-05, %v1154_v52 }
 0xec0   : > { %v1153_v54 = vpop.xlane.xlu1 %1152 }
 0xec1   : > { %1724 = vrsqrt.f32 %v1156_v53  ;;  %v1155_v55 = vmul.f32 0.03125, %v1153_v54 }
 0xec3   : > { %v1157_v56 = vadd.f32 1e-05, %v1155_v55 }
 0xec5   : > { %1726 = vrsqrt.f32 %v1157_v56 }
 0xecb   : > { %v1725_v58 = vpop.eup %1724 }
 0xecc   : > { %v1160_v60 = vmul.f32 %v1725_v58, %v1144_v43 }
 0xece   : > { %v1166_v63 = vmul.f32 %v1165_v59, %v1160_v60  ;;  %v1757_v60 = vmov 1.0  }
 0xecf   : > { %v1727_v61 = vpop.eup %1726 }
 0xed0   : > { %v1161_v2 = vmul.f32 %v1727_v61, %v1145_v46  ;;  %v1172_v5 = vadd.f32 %v1171_v62, %v1166_v63 }
 0xed2   : > { %v1167_v3 = vmul.f32 %v1165_v59, %v1161_v2 }
 0xed4   : > { %v1173_v6 = vadd.f32 %v1171_v62, %v1167_v3 }
 0xed6   : > { %v1174_v8 = vpack.c.bf16 %v1173_v6, %v1172_v5 }
 0xed8   : > { %1631 = vmatmul.mubr.msk.bf16.vlgmr.msra.gmra.mrb[32].mxu1 %vm342_vm0, %v1174_v8 }
 0xfab   : > { %v1235_v16 = vpop.f32.mrb[32].mxu1 }
 0xfac   : > { %v1236_v17 = vadd.f32 %v1490_v14, %v1235_v16  ;;  %v1632_v42 = vpop.f32.mrb[33].mxu1 }
 0xfad   : > { %v1238_v18 = vpop.f32.mrb[34].mxu1 }
 0xfae   : > { %v1244_v19 = vmul.f32 0.70710677, %v1236_v17  ;;  %v1239_v20 = vadd.f32 %v1490_v14, %v1238_v18  ;;  %v1633_v21 = vpop.f32.mrb[35].mxu1  ;;  %v1242_v8 = vmul.f32 0.5, %v1236_v17 }
 0xfb0   : > { %v1250_v22 = vand.u32 2147483647, %v1244_v19  ;;  %v1245_v23 = vmul.f32 0.70710677, %v1239_v20  ;;  %vm1246_vm5 = vcmp.lt.f32.partialorder %v1244_v19, 0.0  ;;  %v1243_v9 = vmul.f32 0.5, %v1239_v20 }
 0xfb1   : > { %v1248_v61 = vsel %vm1246_vm5, -1.0, %v1757_v60 }
 0xfb2   : > { %v1252_v4 = vmul.f32 0.3275911, %v1250_v22  ;;  %v1251_v15 = vand.u32 2147483647, %v1245_v23  ;;  %v1276_v28 = vsub.f32 0.0, %v1250_v22  ;;  %vm1247_vm6 = vcmp.lt.f32.partialorder %v1245_v23, 0.0 }
 0xfb3   : > { %v1249_v3 = vsel %vm1247_vm6, -1.0, %v1757_v60 }
 0xfb4   : > { %v1254_v7 = vadd.f32 1.0, %v1252_v4  ;;  %v1253_v26 = vmul.f32 0.3275911, %v1251_v15  ;;  %v1277_v29 = vsub.f32 0.0, %v1251_v15  ;;  %v1278_v32 = vmul.f32 %v1276_v28, %v1250_v22 }
 0xfb6   : > { %1728 = vrcp.f32 %v1254_v7  ;;  %v1255_v27 = vadd.f32 1.0, %v1253_v26  ;;  %v1279_v38 = vmul.f32 %v1277_v29, %v1251_v15  ;;  %v1280_v39 = vmul.f32 1.442695, %v1278_v32 }
 0xfb8   : > { %1730 = vrcp.f32 %v1255_v27  ;;  %v1282_v0 = vmul.f32 1.442695, %v1279_v38 }
 0xfb9   : > { %1732 = vpow2.f32 %v1280_v39 }
 0xfba   : > { %1734 = vpow2.f32 %v1282_v0 }
 0xfc0   : > { %v1729_v31 = vpop.eup %1728 }
 0xfc1   : > { %v1258_v33 = vmul.f32 1.0614054, %v1729_v31 }
 0xfc2   : > { %v1731_v35 = vpop.eup %1730 }
 0xfc3   : > { %v1260_v36 = vadd.f32 -1.4531521, %v1258_v33  ;;  %v1259_v40 = vmul.f32 1.0614054, %v1731_v35  ;;  %v1733_v54 = vpop.eup %1732 }
 0xfc4   : > { %v1735_v58 = vpop.eup %1734 }
 0xfc5   : > { %v1262_v41 = vmul.f32 %v1729_v31, %v1260_v36  ;;  %v1261_v43 = vadd.f32 -1.4531521, %v1259_v40 }
 0xfc7   : > { %v1264_v44 = vadd.f32 1.4214138, %v1262_v41  ;;  %v1263_v45 = vmul.f32 %v1731_v35, %v1261_v43 }
 0xfc9   : > { %v1266_v46 = vmul.f32 %v1729_v31, %v1264_v44  ;;  %v1265_v1 = vadd.f32 1.4214138, %v1263_v45 }
 0xfcb   : > { %v1268_v47 = vadd.f32 -0.28449672, %v1266_v46  ;;  %v1267_v48 = vmul.f32 %v1731_v35, %v1265_v1 }
 0xfcd   : > { %v1270_v49 = vmul.f32 %v1729_v31, %v1268_v47  ;;  %v1269_v50 = vadd.f32 -0.28449672, %v1267_v48 }
 0xfcf   : > { %v1272_v51 = vadd.f32 0.2548296, %v1270_v49  ;;  %v1271_v52 = vmul.f32 %v1731_v35, %v1269_v50 }
 0xfd1   : > { %v1274_v53 = vmul.f32 %v1729_v31, %v1272_v51  ;;  %v1273_v55 = vadd.f32 0.2548296, %v1271_v52 }
 0xfd3   : > { %v1284_v56 = vmul.f32 %v1733_v54, %v1274_v53  ;;  %v1275_v57 = vmul.f32 %v1731_v35, %v1273_v55 }
 0xfd5   : > { %v1286_v59 = vsub.f32 1.0, %v1284_v56  ;;  %v1285_v62 = vmul.f32 %v1735_v58, %v1275_v57 }
 0xfd7   : > { %v1288_v63 = vmul.f32 %v1286_v59, %v1248_v61  ;;  %v1287_v2 = vsub.f32 1.0, %v1285_v62 }
 0xfd9   : > { %v1290_v5 = vadd.f32 1.0, %v1288_v63  ;;  %v1289_v6 = vmul.f32 %v1287_v2, %v1249_v3 }
 0xfdb   : > { %v1291_v24 = vadd.f32 1.0, %v1289_v6  ;;  %v1292_v25 = vmul.f32 %v1290_v5, %v1242_v8 }
 0xfdd   : > { %v1293_v30 = vmul.f32 %v1291_v24, %v1243_v9 }
 0xfdf   : > { %v1294_v10 = vpack.c.bf16 %v1293_v30, %v1292_v25 }
 0xfe1   : > { %1651 = vmatmul.mubr.bf16.vlgmr.msra.gmra.mrb[20].mxu0 %v1294_v10 }
0x10b4   : > { %v1400_v12 = vpop.f32.mrb[20].mxu0 }
0x10b5   : > { %v1401_v13 = vadd.f32 %v1494_v11, %v1400_v12  ;;  %v1652_v14 = vpop.f32.mrb[21].mxu0 }
0x10b6   : > { %v1403_v16 = vpop.f32.mrb[22].mxu0 }
0x10b7   : > { %v1407_v17 = vadd.f32 %v1401_v13, %v1969_v34  ;;  %v1404_v42 = vadd.f32 %v1494_v11, %v1403_v16  ;;  %v1653_v18 = vpop.f32.mrb[23].mxu0 }
0x10b9   : > { %1409 = vst.msk [vmem:[%s332_s14] sm:$0xff] %vm342_vm0, %v1407_v17  ;;  %v1408_v19 = vadd.f32 %v1404_v42, %v1972_v37 }
0x10bb   : > { %1410 = vst.msk [vmem:[%s332_s14 + $0x8] sm:$0xff] %vm342_vm0, %v1408_v19 }
0x10bc PF: > { %s19_s30 = sadd.s32 1, %s1742_s30  }
0x10bd   : > { %p16_p4 = scmp.ge.s32.totalorder %s19_s30, 4  }
0x10bf   :  { %18 = sbr.rel (!%p16_p4) target bundleno = 1 (0x1), region = 86 }

</bundles_post_ra>
